<compile_context>
chip_gen: v7x
topology: tpu7x:2x2x1
jax: 0.10.0
libtpu: 0.0.40
codegen_flags: <defaults>
</compile_context>

<pallas_src>
import jax
import jax.numpy as jnp
from jax.experimental import pallas as pl
from jax.experimental.pallas import tpu as pltpu

D_PRIME = 512
D = 2048


def attention_kernel(ut_ref, wa_ref, v_ref, out_ref):
    # ut_ref  : [D, D']  bf16  -- cached U_t^T layout, fully resident
    # wa_ref  : [1, D']  f32
    # v_ref   : [N, D]   f32
    # out_ref : [N, D]   f32
    v = v_ref[...]                                            # [N, D] f32

    # bf16 x bf16 MXU matmul with f32 accumulation (single cheap V cast).
    h = jnp.tanh(
        jnp.dot(v.astype(jnp.bfloat16), ut_ref[...],
                preferred_element_type=jnp.float32))          # [N, D'] f32

    # Per-row score: logits[n] = sum_d' W_a[d'] * tanh(...)[n, d']
    s = jnp.sum(h * wa_ref[...], axis=1, keepdims=True)       # [N, 1]

    # softmax over the N dimension (PyTorch softmax(..., dim=1) on [1, N])
    s_max = jnp.max(s, axis=0, keepdims=True)                 # [1, 1]
    e = jnp.exp(s - s_max)                                    # [N, 1]
    denom = jnp.sum(e, axis=0, keepdims=True)                 # [1, 1]
    a = e * pl.reciprocal(denom, approx=True)                 # [N, 1]

    out_ref[...] = (v * a).astype(out_ref.dtype)              # f = V * A


def prepare_params(U_t, W_a):
    """One-time (init-time) parameter caching in kernel-friendly layout.

    U_t [D', D] f32 -> [D, D'] bf16 (transposed once, half the HBM footprint).
    W_a [1, D']  stays f32 (tiny).
    """
    return jnp.asarray(U_t.T, dtype=jnp.bfloat16), jnp.asarray(W_a, jnp.float32)


def attention_forward(ut_t_bf16, W_a, V):
    """ut_t_bf16: [D, D'] bf16 (cached layout), W_a: [1, D'] f32, V: [N, D] f32."""
    N = V.shape[0]

    cost = pl.CostEstimate(
        flops=2 * N * D * D_PRIME + 3 * N * D_PRIME + 2 * N * D,
        transcendentals=N * D_PRIME + N + 1,
        bytes_accessed=D * D_PRIME * 2 + D_PRIME * 4 + 2 * N * D * 4,
    )

    return pl.pallas_call(
        attention_kernel,
        out_shape=jax.ShapeDtypeStruct((N, D), V.dtype),
        in_specs=[
            pl.BlockSpec(memory_space=pltpu.MemorySpace.VMEM),  # U_t^T (full)
            pl.BlockSpec(memory_space=pltpu.MemorySpace.VMEM),  # W_a   (full)
            pl.BlockSpec(memory_space=pltpu.MemorySpace.VMEM),  # V     (full)
        ],
        out_specs=pl.BlockSpec(memory_space=pltpu.MemorySpace.VMEM),
        compiler_params=pltpu.CompilerParams(
            vmem_limit_bytes=32 * 1024 * 1024,   # ~2.2 MiB actually needed
        ),
        cost_estimate=cost,
    )(ut_t_bf16, W_a, V)


if __name__ == "__main__":
    key = jax.random.PRNGKey(0)
    k_ut, k_wa, k_v = jax.random.split(key, 3)

    N = 8  # number of rows in V (sequence of feature vectors)
    # Module parameters (torch.randn equivalents) and input.
    U_t = jax.random.normal(k_ut, (D_PRIME, D), dtype=jnp.float32)
    W_a = jax.random.normal(k_wa, (1, D_PRIME), dtype=jnp.float32)
    V = jax.random.normal(k_v, (N, D), dtype=jnp.float32)

    # One-time parameter caching (init-time, NOT per forward call).
    ut_t_bf16, wa = prepare_params(U_t, W_a)

    f = attention_forward(ut_t_bf16, wa, V)
    f = jax.block_until_ready(f)

    # Reference mirrors the kernel's precision choices: bf16 weight storage and
    # bf16-quantized V for the score matmul, f32 math everywhere else.
    U_ref = ut_t_bf16.T.astype(jnp.float32)
    V_q = V.astype(jnp.bfloat16).astype(jnp.float32)
    tanh_ut_v = jnp.tanh(U_ref @ V_q.T)              # [D', N]
    a = jax.nn.softmax(wa @ tanh_ut_v, axis=1)       # [1, N]
    f_ref = V * a.T                                  # [N, D]

    assert f.shape == (N, D)
    assert jnp.allclose(f, f_ref, rtol=5e-3, atol=1e-3), "mismatch vs reference"

    print("KERNEL_OK")
</pallas_src>

<mosaic_0001>
module attributes {stable_mosaic.version = 11 : i64} {
  func.func @attention_kernel(%arg0: memref<2048x512xbf16, #tpu.memory_space<vmem>>, %arg1: memref<1x512xf32, #tpu.memory_space<vmem>>, %arg2: memref<8x2048xf32, #tpu.memory_space<vmem>>, %arg3: memref<8x2048xf32, #tpu.memory_space<vmem>>) attributes {dimension_semantics = [], scalar_prefetch = 0 : i64, scratch_operands = 0 : i64, tpu.core_type = #tpu.core_type<tc>} {
    %c0 = arith.constant 0 : index
    %c0_0 = arith.constant 0 : index
    %0 = vector.load %arg2[%c0, %c0_0] : memref<8x2048xf32, #tpu.memory_space<vmem>>, vector<8x2048xf32>
    %1 = arith.truncf %0 : vector<8x2048xf32> to vector<8x2048xbf16>
    %c0_1 = arith.constant 0 : index
    %c0_2 = arith.constant 0 : index
    %2 = vector.load %arg0[%c0_1, %c0_2] : memref<2048x512xbf16, #tpu.memory_space<vmem>>, vector<2048x512xbf16>
    %cst = arith.constant dense<0.000000e+00> : vector<8x512xf32>
    %3 = tpu.matmul %1, %2, %cst {dimension_numbers = #tpu.dot_dimension_numbers<[1], [0], [0], [1], [0, 0, 1, 1], [], []>} : vector<8x2048xbf16>, vector<2048x512xbf16>, vector<8x512xf32> -> vector<8x512xf32>
    %4 = math.tanh %3 : vector<8x512xf32>
    %c0_3 = arith.constant 0 : index
    %c0_4 = arith.constant 0 : index
    %5 = vector.load %arg1[%c0_3, %c0_4] : memref<1x512xf32, #tpu.memory_space<vmem>>, vector<1x512xf32>
    %6 = vector.broadcast %5 : vector<1x512xf32> to vector<8x512xf32>
    %7 = arith.mulf %4, %6 : vector<8x512xf32>
    %cst_5 = arith.constant dense<0.000000e+00> : vector<8xf32>
    %8 = vector.multi_reduction <add>, %7, %cst_5 [1] : vector<8x512xf32> to vector<8xf32>
    %9 = vector.shape_cast %8 : vector<8xf32> to vector<8x1xf32>
    %cst_6 = arith.constant dense<0xFF800000> : vector<1xf32>
    %10 = vector.multi_reduction <maximumf>, %9, %cst_6 [0] : vector<8x1xf32> to vector<1xf32>
    %11 = vector.shape_cast %10 : vector<1xf32> to vector<1x1xf32>
    %12 = vector.broadcast %11 : vector<1x1xf32> to vector<8x1xf32>
    %13 = arith.subf %9, %12 : vector<8x1xf32>
    %14 = math.exp %13 : vector<8x1xf32>
    %cst_7 = arith.constant dense<0.000000e+00> : vector<1xf32>
    %15 = vector.multi_reduction <add>, %14, %cst_7 [0] : vector<8x1xf32> to vector<1xf32>
    %16 = vector.shape_cast %15 : vector<1xf32> to vector<1x1xf32>
    %17 = tpu.reciprocal %16 {approx = true} : vector<1x1xf32> -> vector<1x1xf32>
    %18 = vector.broadcast %17 : vector<1x1xf32> to vector<8x1xf32>
    %19 = arith.mulf %14, %18 : vector<8x1xf32>
    %20 = vector.broadcast %19 : vector<8x1xf32> to vector<8x2048xf32>
    %21 = arith.mulf %0, %20 : vector<8x2048xf32>
    %c0_8 = arith.constant 0 : index
    %c0_9 = arith.constant 0 : index
    %22 = vector.load %arg3[%c0_8, %c0_9] : memref<8x2048xf32, #tpu.memory_space<vmem>>, vector<8x2048xf32>
    tpu.vector_store %arg3[%c0_8, %c0_9], %21 {strides = array<i32>} : memref<8x2048xf32, #tpu.memory_space<vmem>>, vector<8x2048xf32>,
    return
  }
}

</mosaic_0001>

<bundles_post_ra>
// kernel: tpu_custom_call.1
= control target key start
LH: loop header
LB: loop body
LE: loop exit
PB: predicated region body
PF: predicated region fallthrough
CT: control target
= control target key end

     0   :  { %8 = vsyncpa [#allocation3], 0  ;;  %s5485_s0 = inlined_call_operand.hbm [shape: bf16[2048,512], index: 0, kind: input, shape index: {}]   ;;  %s5486_s1 = inlined_call_operand.hbm [shape: f32[1,512], index: 1, kind: input, shape index: {}]   ;;  %s5487_s2 = inlined_call_operand.hbm [shape: f32[8,2048], index: 2, kind: input, shape index: {}]   ;;  %s5488_s3 = inlined_call_operand.hbm [shape: f32[8,2048], index: 3, kind: output, shape index: {}]  }
   0x1   :  { %9 = vsyncpa [#allocation6], 0 }
   0x2   :  { %10 = vsyncpa [#allocation4], 0  ;;  %s5369_s12 = smov [#allocation5]   ;;  %s5370_s14 = smov [#allocation2]  }
   0x3   :  { %s29_s13 = sshll.u32 %s5369_s12, 4  ;;  %s16_s15 = sshll.u32 %s5370_s14, 4  ;;  %s30_s13 = int_to_ptr.vmem [resolvable:$true] %s29_s13  ;;  %s5395_s15 = int_to_ptr.vmem [resolvable:$true] %s16_s15 }
   0x4   :  { %s5275_s18 = scalar_lea.hbm %s5486_s1, 64 }
   0x5   :  { %p5276_p0 = scmp.ne.s32.totalorder %s5486_s1, %s5275_s18  ;;  %p5279_p1 = scmp.lt.u32.totalorder %s5275_s18, %s5486_s1 }
   0x7   :  { %p5281_p2 = pnand %p5279_p1, %p5276_p0 }
   0x9   :  { %5284 = shalt.err (!%p5281_p2)
}
   0xa   :  { %s5285_s23 = scalar_lea.vmem %s30_s13, 64  ;;  %p5290_p4 = scmp.lt.s32.totalorder %s30_s13, %s30_s13 }
   0xb   :  { %p5286_p3 = scmp.ne.s32.totalorder %s30_s13, %s5285_s23  ;;  %p5291_p5 = scmp.lt.s32.totalorder %s5285_s23, %s5285_s23 }
   0xd   :  { %p5292_p6 = por %p5291_p5, %p5290_p4 }
   0xf   :  { %p5293_p7 = pnand %p5292_p6, %p5286_p3 }
  0x11   :  { %5296 = shalt.err (!%p5293_p7)
}
  0x12   :  { %32 = dma.hbm_to_vmem [thread:$0]  %s5486_s1, 64, %s30_s13, [#allocation6]  }
  0x13   :  { %s5297_s28 = scalar_lea.hbm %s5485_s0, 65536 }
  0x14   :  { %p5298_p8 = scmp.ne.s32.totalorder %s5485_s0, %s5297_s28  ;;  %p5301_p9 = scmp.lt.u32.totalorder %s5297_s28, %s5485_s0 }
  0x16   :  { %p5303_p10 = pnand %p5301_p9, %p5298_p8 }
  0x18   :  { %5306 = shalt.err (!%p5303_p10)
}
  0x19   :  { %s5307_s6 = scalar_lea.vmem %s5395_s15, 65536  ;;  %p5312_p12 = scmp.lt.s32.totalorder %s5395_s15, %s5395_s15 }
  0x1a   :  { %p5308_p11 = scmp.ne.s32.totalorder %s5395_s15, %s5307_s6  ;;  %p5313_p13 = scmp.lt.s32.totalorder %s5307_s6, %s5307_s6 }
  0x1c   :  { %p5314_p0 = por %p5313_p13, %p5312_p12 }
  0x1e   :  { %p5315_p1 = pnand %p5314_p0, %p5308_p11 }
  0x20   :  { %5318 = shalt.err (!%p5315_p1)
}
  0x21   :  { %s5371_s1 = smov 256   ;;  %s5372_s7 = smov 16  }
  0x22   :  { %22 = dma.hbm_to_vmem [thread:$0]  %s5485_s0, 65536, %s5395_s15, [#allocation3], %s5371_s1, %s5371_s1, %s5372_s7  }
  0x23   :  { %s5373_s10 = smov [#allocation7]   ;;  %s5319_s14 = scalar_lea.hbm %s5487_s2, 2048 }
  0x24   :  { %s39_s11 = sshll.u32 %s5373_s10, 4  ;;  %p5320_p2 = scmp.ne.s32.totalorder %s5487_s2, %s5319_s14  ;;  %s40_s11 = int_to_ptr.vmem [resolvable:$true] %s39_s11 }
  0x25   :  { %p5323_p3 = scmp.lt.u32.totalorder %s5319_s14, %s5487_s2 }
  0x27   :  { %p5325_p4 = pnand %p5323_p3, %p5320_p2 }
  0x29   :  { %5328 = shalt.err (!%p5325_p4)
}
  0x2a   :  { %s5329_s20 = scalar_lea.vmem %s40_s11, 2048  ;;  %p5334_p6 = scmp.lt.s32.totalorder %s40_s11, %s40_s11 }
  0x2b   :  { %p5330_p5 = scmp.ne.s32.totalorder %s40_s11, %s5329_s20  ;;  %p5335_p7 = scmp.lt.s32.totalorder %s5329_s20, %s5329_s20 }
  0x2d   :  { %p5336_p8 = por %p5335_p7, %p5334_p6 }
  0x2f   :  { %p5337_p9 = pnand %p5336_p8, %p5330_p5 }
  0x31   :  { %5340 = shalt.err (!%p5337_p9)
}
  0x32   :  { %42 = dma.hbm_to_vmem [thread:$0]  %s5487_s2, 2048, %s40_s11, [#allocation6]  }
  0x33   :  { %5363 = dma.done.wait [#allocation3], 65536  }
  0x34   :  { %5364 = vsyncadd [#allocation3], 4294901760 }
  0x35   :  { %5365 = dma.done.wait [#allocation6], 2112  }
  0x36   :  { %5366 = vsyncadd [#allocation6], 4294965184  ;;  %v4486_v0 = vld [vmem:[#allocation2 + $0x4] ss:$16 sps:$4 sm:$0xff]   ;;  %v4488_v1 = vld [vmem:[#allocation2 + $0xc] ss:$16 sps:$4 sm:$0xff]  }
  0x37   :  { %3156 = vmatprep.subr.bf16.mxu0 %v4486_v0  ;;  %v4490_v2 = vld [vmem:[#allocation2] ss:$16 sps:$4 sm:$0xff]   ;;  %v4491_v3 = vld [vmem:[#allocation2 + $0x8] ss:$16 sps:$4 sm:$0xff]   ;;  %3484 = vmatprep.subr.bf16.mxu1 %v4488_v1  ;;  %v4492_v4 = vld [vmem:[#allocation2 + $0x24] ss:$16 sps:$4 sm:$0xff]  }
  0x38   :  { %3157 = vmatpush1.bf16.msra.mxu0 %v4490_v2  ;;  %3485 = vmatpush1.bf16.msra.mxu1 %v4491_v3  ;;  %v4494_v5 = vld [vmem:[#allocation2 + $0x2c] ss:$16 sps:$4 sm:$0xff]   ;;  %v4496_v6 = vld [vmem:[#allocation2 + $0x20] ss:$16 sps:$4 sm:$0xff]   ;;  %v4497_v7 = vld [vmem:[#allocation2 + $0x28] ss:$16 sps:$4 sm:$0xff]  }
  0x39   :  { %3158 = vmatprep.subr.bf16.mxu0 %v4492_v4  ;;  %3486 = vmatprep.subr.bf16.mxu1 %v4494_v5  ;;  %v4498_v8 = vld [vmem:[#allocation2 + $0x44] ss:$16 sps:$4 sm:$0xff]   ;;  %v4500_v9 = vld [vmem:[#allocation2 + $0x4c] ss:$16 sps:$4 sm:$0xff]   ;;  %v4502_v10 = vld [vmem:[#allocation2 + $0x40] ss:$16 sps:$4 sm:$0xff]  }
  0x3a   :  { %v4503_v11 = vld [vmem:[#allocation2 + $0x48] ss:$16 sps:$4 sm:$0xff]   ;;  %v4504_v12 = vld [vmem:[#allocation2 + $0x64] ss:$16 sps:$4 sm:$0xff]   ;;  %v4506_v13 = vld [vmem:[#allocation2 + $0x6c] ss:$16 sps:$4 sm:$0xff]  }
  0x3b   :  { %v4508_v14 = vld [vmem:[#allocation2 + $0x60] ss:$16 sps:$4 sm:$0xff]   ;;  %v4509_v15 = vld [vmem:[#allocation2 + $0x68] ss:$16 sps:$4 sm:$0xff]   ;;  %v4510_v16 = vld [vmem:[#allocation2 + $0x84] ss:$16 sps:$4 sm:$0xff]  }
  0x3c   :  { %3159 = vmatpush1.bf16.msra.mxu0 %v4496_v6  ;;  %3487 = vmatpush1.bf16.msra.mxu1 %v4497_v7  ;;  %v4512_v17 = vld [vmem:[#allocation2 + $0x8c] ss:$16 sps:$4 sm:$0xff]   ;;  %v4514_v18 = vld [vmem:[#allocation2 + $0x80] ss:$16 sps:$4 sm:$0xff]   ;;  %v4515_v19 = vld [vmem:[#allocation2 + $0x88] ss:$16 sps:$4 sm:$0xff]  }
  0x3d   :  { %3160 = vmatprep.subr.bf16.mxu0 %v4498_v8  ;;  %3488 = vmatprep.subr.bf16.mxu1 %v4500_v9  ;;  %v4516_v20 = vld [vmem:[#allocation2 + $0xa4] ss:$16 sps:$4 sm:$0xff]   ;;  %v4518_v21 = vld [vmem:[#allocation2 + $0xac] ss:$16 sps:$4 sm:$0xff]   ;;  %v4520_v22 = vld [vmem:[#allocation2 + $0xa0] ss:$16 sps:$4 sm:$0xff]  }
  0x3e   :  { %v4521_v23 = vld [vmem:[#allocation2 + $0xa8] ss:$16 sps:$4 sm:$0xff]   ;;  %v4522_v24 = vld [vmem:[#allocation2 + $0xc4] ss:$16 sps:$4 sm:$0xff]   ;;  %v4524_v25 = vld [vmem:[#allocation2 + $0xcc] ss:$16 sps:$4 sm:$0xff]  }
  0x3f   :  { %v4526_v26 = vld [vmem:[#allocation2 + $0xc0] ss:$16 sps:$4 sm:$0xff]   ;;  %v4527_v27 = vld [vmem:[#allocation2 + $0xc8] ss:$16 sps:$4 sm:$0xff]   ;;  %v4528_v28 = vld [vmem:[#allocation2 + $0xe4] ss:$16 sps:$4 sm:$0xff]  }
  0x40   :  { %3161 = vmatpush1.bf16.msra.mxu0 %v4502_v10  ;;  %3489 = vmatpush1.bf16.msra.mxu1 %v4503_v11  ;;  %v4530_v29 = vld [vmem:[#allocation2 + $0xec] ss:$16 sps:$4 sm:$0xff]   ;;  %v4532_v30 = vld [vmem:[#allocation2 + $0xe0] ss:$16 sps:$4 sm:$0xff]   ;;  %v4533_v31 = vld [vmem:[#allocation2 + $0xe8] ss:$16 sps:$4 sm:$0xff]  }
  0x41   :  { %3162 = vmatprep.subr.bf16.mxu0 %v4504_v12  ;;  %3490 = vmatprep.subr.bf16.mxu1 %v4506_v13  ;;  %v4534_v32 = vld [vmem:[#allocation2 + $0x104] ss:$16 sps:$4 sm:$0xff]   ;;  %v4536_v33 = vld [vmem:[#allocation2 + $0x10c] ss:$16 sps:$4 sm:$0xff]   ;;  %v4538_v34 = vld [vmem:[#allocation2 + $0x100] ss:$16 sps:$4 sm:$0xff]  }
  0x42   :  { %v4539_v35 = vld [vmem:[#allocation2 + $0x108] ss:$16 sps:$4 sm:$0xff]   ;;  %v4540_v36 = vld [vmem:[#allocation2 + $0x124] ss:$16 sps:$4 sm:$0xff]   ;;  %v4542_v37 = vld [vmem:[#allocation2 + $0x12c] ss:$16 sps:$4 sm:$0xff]  }
  0x43   :  { %v4544_v38 = vld [vmem:[#allocation2 + $0x120] ss:$16 sps:$4 sm:$0xff]   ;;  %v4545_v39 = vld [vmem:[#allocation2 + $0x128] ss:$16 sps:$4 sm:$0xff]   ;;  %v4546_v40 = vld [vmem:[#allocation2 + $0x144] ss:$16 sps:$4 sm:$0xff]  }
  0x44   :  { %3163 = vmatpush1.bf16.msra.mxu0 %v4508_v14  ;;  %3491 = vmatpush1.bf16.msra.mxu1 %v4509_v15  ;;  %v4548_v41 = vld [vmem:[#allocation2 + $0x14c] ss:$16 sps:$4 sm:$0xff]   ;;  %v4550_v42 = vld [vmem:[#allocation2 + $0x140] ss:$16 sps:$4 sm:$0xff]   ;;  %v4551_v43 = vld [vmem:[#allocation2 + $0x148] ss:$16 sps:$4 sm:$0xff]  }
  0x45   :  { %3164 = vmatprep.subr.bf16.mxu0 %v4510_v16  ;;  %3492 = vmatprep.subr.bf16.mxu1 %v4512_v17  ;;  %v4552_v44 = vld [vmem:[#allocation2 + $0x164] ss:$16 sps:$4 sm:$0xff]   ;;  %v4554_v45 = vld [vmem:[#allocation2 + $0x16c] ss:$16 sps:$4 sm:$0xff]   ;;  %v4556_v47 = vld [vmem:[#allocation2 + $0x160] ss:$16 sps:$4 sm:$0xff]  }
  0x46   :  { %v53_v46 = vld [vmem:[#allocation7 + $0x8] sm:$0xff]  ;;  %v4557_v49 = vld [vmem:[#allocation2 + $0x168] ss:$16 sps:$4 sm:$0xff]   ;;  %v4558_v50 = vld [vmem:[#allocation2 + $0x184] ss:$16 sps:$4 sm:$0xff]   ;;  %s5374_s2 = smov [#allocation8]  }
  0x47   :  { %v69_v48 = vpack.c.bf16 %v53_v46, %v53_v46  ;;  %v4560_v51 = vld [vmem:[#allocation2 + $0x18c] ss:$16 sps:$4 sm:$0xff]   ;;  %v4562_v52 = vld [vmem:[#allocation2 + $0x180] ss:$16 sps:$4 sm:$0xff]   ;;  %v4563_v53 = vld [vmem:[#allocation2 + $0x188] ss:$16 sps:$4 sm:$0xff]  }
  0x48   :  { %3165 = vmatpush1.bf16.msra.mxu0 %v4514_v18  ;;  %3493 = vmatpush1.bf16.msra.mxu1 %v4515_v19  ;;  %v4564_v54 = vld [vmem:[#allocation2 + $0x1a4] ss:$16 sps:$4 sm:$0xff]   ;;  %v4566_v55 = vld [vmem:[#allocation2 + $0x1ac] ss:$16 sps:$4 sm:$0xff]   ;;  %v4568_v56 = vld [vmem:[#allocation2 + $0x1a0] ss:$16 sps:$4 sm:$0xff]  }
  0x49   :  { %3166 = vmatprep.subr.bf16.mxu0 %v4516_v20  ;;  %3494 = vmatprep.subr.bf16.mxu1 %v4518_v21  ;;  %v4569_v57 = vld [vmem:[#allocation2 + $0x1a8] ss:$16 sps:$4 sm:$0xff]   ;;  %v4570_v58 = vld [vmem:[#allocation2 + $0x1c4] ss:$16 sps:$4 sm:$0xff]   ;;  %v4572_v59 = vld [vmem:[#allocation2 + $0x1cc] ss:$16 sps:$4 sm:$0xff]  }
  0x4a   :  { %3188 = vmatprep.mubr.bf16.mxu0 %v69_v48  ;;  %3516 = vmatprep.mubr.bf16.mxu1 %v69_v48  ;;  %v4574_v60 = vld [vmem:[#allocation2 + $0x1c0] ss:$16 sps:$4 sm:$0xff]   ;;  %v4575_v61 = vld [vmem:[#allocation2 + $0x1c8] ss:$16 sps:$4 sm:$0xff]   ;;  %v4576_v62 = vld [vmem:[#allocation2 + $0x1e4] ss:$16 sps:$4 sm:$0xff]  }
  0x4b   :  { %v4578_v63 = vld [vmem:[#allocation2 + $0x1ec] ss:$16 sps:$4 sm:$0xff]   ;;  %v4580_v0 = vld [vmem:[#allocation2 + $0x1e0] ss:$16 sps:$4 sm:$0xff]   ;;  %v4581_v1 = vld [vmem:[#allocation2 + $0x1e8] ss:$16 sps:$4 sm:$0xff]  }
  0x4c   :  { %3167 = vmatpush1.bf16.msra.mxu0 %v4520_v22  ;;  %3495 = vmatpush1.bf16.msra.mxu1 %v4521_v23  ;;  %v52_v2 = vld [vmem:[#allocation7] sm:$0xff]  ;;  %v4587_v4 = vld [vmem:[#allocation2 + $0x20c] ss:$16 sps:$4 sm:$0xff]   ;;  %v4582_v6 = vld [vmem:[#allocation2 + $0x200] ss:$16 sps:$4 sm:$0xff]   ;;  %s3902_s21 = sshll.u32 %s5374_s2, 4  ;;  %s3903_s21 = int_to_ptr.vmem [resolvable:$true] %s3902_s21 }
  0x4d   :  { %3168 = vmatprep.subr.bf16.mxu0 %v4522_v24  ;;  %3496 = vmatprep.subr.bf16.mxu1 %v4524_v25  ;;  %v4584_v3 = vld [vmem:[#allocation2 + $0x204] ss:$16 sps:$4 sm:$0xff]   ;;  %v68_v5 = vpack.c.bf16 %v52_v2, %v52_v2  ;;  %v4585_v7 = vld [vmem:[#allocation2 + $0x208] ss:$16 sps:$4 sm:$0xff]   ;;  %v4593_v9 = vld [vmem:[#allocation2 + $0x22c] ss:$16 sps:$4 sm:$0xff]   ;;  %p5346_p11 = scmp.lt.s32.totalorder %s3903_s21, %s3903_s21 }
  0x4e   :  { %v4590_v8 = vld [vmem:[#allocation2 + $0x224] ss:$16 sps:$4 sm:$0xff]   ;;  %v4588_v10 = vld [vmem:[#allocation2 + $0x220] ss:$16 sps:$4 sm:$0xff]   ;;  %v4591_v11 = vld [vmem:[#allocation2 + $0x228] ss:$16 sps:$4 sm:$0xff]  }
  0x4f   :  { %v4596_v12 = vld [vmem:[#allocation2 + $0x244] ss:$16 sps:$4 sm:$0xff]   ;;  %v4599_v13 = vld [vmem:[#allocation2 + $0x24c] ss:$16 sps:$4 sm:$0xff]   ;;  %v4594_v14 = vld [vmem:[#allocation2 + $0x240] ss:$16 sps:$4 sm:$0xff]  }
  0x50   :  { %3169 = vmatpush1.bf16.msra.mxu0 %v4526_v26  ;;  %3497 = vmatpush1.bf16.msra.mxu1 %v4527_v27  ;;  %v4597_v15 = vld [vmem:[#allocation2 + $0x248] ss:$16 sps:$4 sm:$0xff]   ;;  %v4602_v16 = vld [vmem:[#allocation2 + $0x264] ss:$16 sps:$4 sm:$0xff]   ;;  %v4605_v17 = vld [vmem:[#allocation2 + $0x26c] ss:$16 sps:$4 sm:$0xff]  }
  0x51   :  { %3170 = vmatprep.subr.bf16.mxu0 %v4528_v28  ;;  %3498 = vmatprep.subr.bf16.mxu1 %v4530_v29  ;;  %v4600_v18 = vld [vmem:[#allocation2 + $0x260] ss:$16 sps:$4 sm:$0xff]   ;;  %v4603_v19 = vld [vmem:[#allocation2 + $0x268] ss:$16 sps:$4 sm:$0xff]   ;;  %v4608_v20 = vld [vmem:[#allocation2 + $0x284] ss:$16 sps:$4 sm:$0xff]  }
  0x52   :  { %v4611_v21 = vld [vmem:[#allocation2 + $0x28c] ss:$16 sps:$4 sm:$0xff]   ;;  %v4606_v22 = vld [vmem:[#allocation2 + $0x280] ss:$16 sps:$4 sm:$0xff]   ;;  %v4609_v23 = vld [vmem:[#allocation2 + $0x288] ss:$16 sps:$4 sm:$0xff]  }
  0x53   :  { %v4614_v24 = vld [vmem:[#allocation2 + $0x2a4] ss:$16 sps:$4 sm:$0xff]   ;;  %v4617_v25 = vld [vmem:[#allocation2 + $0x2ac] ss:$16 sps:$4 sm:$0xff]   ;;  %v4612_v26 = vld [vmem:[#allocation2 + $0x2a0] ss:$16 sps:$4 sm:$0xff]  }
  0x54   :  { %3171 = vmatpush1.bf16.msra.mxu0 %v4532_v30  ;;  %3499 = vmatpush1.bf16.msra.mxu1 %v4533_v31  ;;  %v4615_v27 = vld [vmem:[#allocation2 + $0x2a8] ss:$16 sps:$4 sm:$0xff]   ;;  %v4620_v28 = vld [vmem:[#allocation2 + $0x2c4] ss:$16 sps:$4 sm:$0xff]   ;;  %v4623_v29 = vld [vmem:[#allocation2 + $0x2cc] ss:$16 sps:$4 sm:$0xff]  }
  0x55   :  { %3172 = vmatprep.subr.bf16.mxu0 %v4534_v32  ;;  %3500 = vmatprep.subr.bf16.mxu1 %v4536_v33  ;;  %v55_v30 = vld [vmem:[#allocation7 + $0x18] sm:$0xff]  ;;  %v4621_v33 = vld [vmem:[#allocation2 + $0x2c8] ss:$16 sps:$4 sm:$0xff]   ;;  %v4644_v46 = vld [vmem:[#allocation2 + $0x344] ss:$16 sps:$4 sm:$0xff]   ;;  %s5341_s22 = scalar_lea.vmem %s3903_s21, 2048 }
  0x56   :  { %v4618_v31 = vld [vmem:[#allocation2 + $0x2c0] ss:$16 sps:$4 sm:$0xff]   ;;  %v71_v32 = vpack.c.bf16 %v55_v30, %v55_v30  ;;  %v4674_v2 = vld [vmem:[#allocation2 + $0x3e4] ss:$16 sps:$4 sm:$0xff]   ;;  %p5342_p10 = scmp.ne.s32.totalorder %s3903_s21, %s5341_s22  ;;  %p5347_p12 = scmp.lt.s32.totalorder %s5341_s22, %s5341_s22 }
  0x57   :  { %v4642_v48 = vld [vmem:[#allocation2 + $0x340] ss:$16 sps:$4 sm:$0xff]   ;;  %v4710_v30 = vld [vmem:[#allocation2 + $0x4a4] ss:$16 sps:$4 sm:$0xff]  }
  0x58   :  { %3173 = vmatpush1.bf16.msra.mxu0 %v4538_v34  ;;  %3501 = vmatpush1.bf16.msra.mxu1 %v4539_v35  ;;  %v4626_v34 = vld [vmem:[#allocation2 + $0x2e4] ss:$16 sps:$4 sm:$0xff]   ;;  %v4629_v35 = vld [vmem:[#allocation2 + $0x2ec] ss:$16 sps:$4 sm:$0xff]   ;;  %p5348_p13 = por %p5347_p12, %p5346_p11 }
  0x59   :  { %3174 = vmatprep.subr.bf16.mxu0 %v4540_v36  ;;  %3502 = vmatprep.subr.bf16.mxu1 %v4542_v37  ;;  %v4624_v36 = vld [vmem:[#allocation2 + $0x2e0] ss:$16 sps:$4 sm:$0xff]   ;;  %v4627_v37 = vld [vmem:[#allocation2 + $0x2e8] ss:$16 sps:$4 sm:$0xff]  }
  0x5a   :  { %p5349_p0 = pnand %p5348_p13, %p5342_p10 }
  0x5c   :  { %3175 = vmatpush1.bf16.msra.mxu0 %v4544_v38  ;;  %3503 = vmatpush1.bf16.msra.mxu1 %v4545_v39  ;;  %v4632_v38 = vld [vmem:[#allocation2 + $0x304] ss:$16 sps:$4 sm:$0xff]   ;;  %v4635_v39 = vld [vmem:[#allocation2 + $0x30c] ss:$16 sps:$4 sm:$0xff]  }
  0x5d   :  { %3176 = vmatprep.subr.bf16.mxu0 %v4546_v40  ;;  %3504 = vmatprep.subr.bf16.mxu1 %v4548_v41  ;;  %v4630_v40 = vld [vmem:[#allocation2 + $0x300] ss:$16 sps:$4 sm:$0xff]   ;;  %v4633_v41 = vld [vmem:[#allocation2 + $0x308] ss:$16 sps:$4 sm:$0xff]  }
  0x60   :  { %3177 = vmatpush1.bf16.msra.mxu0 %v4550_v42  ;;  %3505 = vmatpush1.bf16.msra.mxu1 %v4551_v43  ;;  %v4638_v42 = vld [vmem:[#allocation2 + $0x324] ss:$16 sps:$4 sm:$0xff]   ;;  %v4641_v43 = vld [vmem:[#allocation2 + $0x32c] ss:$16 sps:$4 sm:$0xff]  }
  0x61   :  { %3178 = vmatprep.subr.bf16.mxu0 %v4552_v44  ;;  %3506 = vmatprep.subr.bf16.mxu1 %v4554_v45  ;;  %v4636_v44 = vld [vmem:[#allocation2 + $0x320] ss:$16 sps:$4 sm:$0xff]   ;;  %v4639_v45 = vld [vmem:[#allocation2 + $0x328] ss:$16 sps:$4 sm:$0xff]  }
  0x64   :  { %3179 = vmatpush1.bf16.msra.mxu0 %v4556_v47  ;;  %3507 = vmatpush1.bf16.msra.mxu1 %v4557_v49  ;;  %v4647_v47 = vld [vmem:[#allocation2 + $0x34c] ss:$16 sps:$4 sm:$0xff]   ;;  %v4645_v49 = vld [vmem:[#allocation2 + $0x348] ss:$16 sps:$4 sm:$0xff]  }
  0x65   :  { %3180 = vmatprep.subr.bf16.mxu0 %v4558_v50  ;;  %3508 = vmatprep.subr.bf16.mxu1 %v4560_v51  ;;  %v4650_v50 = vld [vmem:[#allocation2 + $0x364] ss:$16 sps:$4 sm:$0xff]   ;;  %v4653_v51 = vld [vmem:[#allocation2 + $0x36c] ss:$16 sps:$4 sm:$0xff]  }
  0x68   :  { %3181 = vmatpush1.bf16.msra.mxu0 %v4562_v52  ;;  %3509 = vmatpush1.bf16.msra.mxu1 %v4563_v53  ;;  %v4648_v52 = vld [vmem:[#allocation2 + $0x360] ss:$16 sps:$4 sm:$0xff]   ;;  %v4651_v53 = vld [vmem:[#allocation2 + $0x368] ss:$16 sps:$4 sm:$0xff]  }
  0x69   :  { %3182 = vmatprep.subr.bf16.mxu0 %v4564_v54  ;;  %3510 = vmatprep.subr.bf16.mxu1 %v4566_v55  ;;  %v4656_v54 = vld [vmem:[#allocation2 + $0x384] ss:$16 sps:$4 sm:$0xff]   ;;  %v4659_v55 = vld [vmem:[#allocation2 + $0x38c] ss:$16 sps:$4 sm:$0xff]  }
  0x6c   :  { %3183 = vmatpush1.bf16.msra.mxu0 %v4568_v56  ;;  %3511 = vmatpush1.bf16.msra.mxu1 %v4569_v57  ;;  %v4654_v56 = vld [vmem:[#allocation2 + $0x380] ss:$16 sps:$4 sm:$0xff]   ;;  %v4657_v57 = vld [vmem:[#allocation2 + $0x388] ss:$16 sps:$4 sm:$0xff]  }
  0x6d   :  { %3184 = vmatprep.subr.bf16.mxu0 %v4570_v58  ;;  %3512 = vmatprep.subr.bf16.mxu1 %v4572_v59  ;;  %v4662_v58 = vld [vmem:[#allocation2 + $0x3a4] ss:$16 sps:$4 sm:$0xff]   ;;  %v4665_v59 = vld [vmem:[#allocation2 + $0x3ac] ss:$16 sps:$4 sm:$0xff]  }
  0x70   :  { %3185 = vmatpush1.bf16.msra.mxu0 %v4574_v60  ;;  %3513 = vmatpush1.bf16.msra.mxu1 %v4575_v61  ;;  %v4660_v60 = vld [vmem:[#allocation2 + $0x3a0] ss:$16 sps:$4 sm:$0xff]   ;;  %v4663_v61 = vld [vmem:[#allocation2 + $0x3a8] ss:$16 sps:$4 sm:$0xff]  }
  0x71   :  { %3186 = vmatprep.subr.bf16.mxu0 %v4576_v62  ;;  %3514 = vmatprep.subr.bf16.mxu1 %v4578_v63  ;;  %v4668_v62 = vld [vmem:[#allocation2 + $0x3c4] ss:$16 sps:$4 sm:$0xff]   ;;  %v4671_v63 = vld [vmem:[#allocation2 + $0x3cc] ss:$16 sps:$4 sm:$0xff]  }
  0x74   :  { %3187 = vmatpush1.bf16.msra.mxu0 %v4580_v0  ;;  %3515 = vmatpush1.bf16.msra.mxu1 %v4581_v1  ;;  %v4666_v0 = vld [vmem:[#allocation2 + $0x3c0] ss:$16 sps:$4 sm:$0xff]   ;;  %v4669_v1 = vld [vmem:[#allocation2 + $0x3c8] ss:$16 sps:$4 sm:$0xff]  }
  0x75   :  { %3197 = vmatprep.subr.bf16.mxu0 %v4584_v3  ;;  %3525 = vmatprep.subr.bf16.mxu1 %v4587_v4  ;;  %v4677_v3 = vld [vmem:[#allocation2 + $0x3ec] ss:$16 sps:$4 sm:$0xff]   ;;  %v4672_v4 = vld [vmem:[#allocation2 + $0x3e0] ss:$16 sps:$4 sm:$0xff]  }
  0x77   :  { %3189 = vmatmul.mubr.bf16.vlgmr.msra.gmra.mrb[0].mxu0 %v68_v5  ;;  %3517 = vmatmul.mubr.bf16.vlgmr.msra.gmra.mrb[0].mxu1 %v68_v5  ;;  %v4675_v5 = vld [vmem:[#allocation2 + $0x3e8] ss:$16 sps:$4 sm:$0xff]  }
  0x78   :  { %3198 = vmatpush1.bf16.msra.mxu0 %v4582_v6  ;;  %3526 = vmatpush1.bf16.msra.mxu1 %v4585_v7  ;;  %v4680_v6 = vld [vmem:[#allocation2 + $0x404] ss:$16 sps:$4 sm:$0xff]  }
  0x79   :  { %3199 = vmatprep.subr.bf16.mxu0 %v4590_v8  ;;  %3527 = vmatprep.subr.bf16.mxu1 %v4593_v9  ;;  %v54_v7 = vld [vmem:[#allocation7 + $0x10] sm:$0xff]  ;;  %v4683_v8 = vld [vmem:[#allocation2 + $0x40c] ss:$16 sps:$4 sm:$0xff]   ;;  %v4678_v9 = vld [vmem:[#allocation2 + $0x400] ss:$16 sps:$4 sm:$0xff]  }
  0x7a   :  { %3229 = vmatprep.mubr.bf16.mxu0 %v71_v32  ;;  %3557 = vmatprep.mubr.bf16.mxu1 %v71_v32  ;;  %v4708_v32 = vld [vmem:[#allocation2 + $0x4a0] ss:$16 sps:$4 sm:$0xff]  }
  0x7c   :  { %3200 = vmatpush1.bf16.msra.mxu0 %v4588_v10  ;;  %3528 = vmatpush1.bf16.msra.mxu1 %v4591_v11  ;;  %v4681_v10 = vld [vmem:[#allocation2 + $0x408] ss:$16 sps:$4 sm:$0xff]   ;;  %v70_v11 = vpack.c.bf16 %v54_v7, %v54_v7  ;;  %v4773_v7 = vld [vmem:[#allocation2 + $0x5ec] ss:$16 sps:$4 sm:$0xff]  }
  0x7d   :  { %3201 = vmatprep.subr.bf16.mxu0 %v4596_v12  ;;  %3529 = vmatprep.subr.bf16.mxu1 %v4599_v13  ;;  %v4686_v12 = vld [vmem:[#allocation2 + $0x424] ss:$16 sps:$4 sm:$0xff]   ;;  %v4689_v13 = vld [vmem:[#allocation2 + $0x42c] ss:$16 sps:$4 sm:$0xff]  }
  0x80   :  { %3202 = vmatpush1.bf16.msra.mxu0 %v4594_v14  ;;  %3530 = vmatpush1.bf16.msra.mxu1 %v4597_v15  ;;  %v57_v14 = vld [vmem:[#allocation7 + $0x28] sm:$0xff] }
  0x81   :  { %3203 = vmatprep.subr.bf16.mxu0 %v4602_v16  ;;  %3531 = vmatprep.subr.bf16.mxu1 %v4605_v17  ;;  %v73_v15 = vpack.c.bf16 %v57_v14, %v57_v14  ;;  %v4684_v16 = vld [vmem:[#allocation2 + $0x420] ss:$16 sps:$4 sm:$0xff]   ;;  %v4687_v17 = vld [vmem:[#allocation2 + $0x428] ss:$16 sps:$4 sm:$0xff]  }
  0x82   :  { %v4777_v14 = vld [vmem:[#allocation2 + $0x608] ss:$16 sps:$4 sm:$0xff]  }
  0x84   :  { %3204 = vmatpush1.bf16.msra.mxu0 %v4600_v18  ;;  %3532 = vmatpush1.bf16.msra.mxu1 %v4603_v19  ;;  %v4692_v18 = vld [vmem:[#allocation2 + $0x444] ss:$16 sps:$4 sm:$0xff]   ;;  %v4695_v19 = vld [vmem:[#allocation2 + $0x44c] ss:$16 sps:$4 sm:$0xff]  }
  0x85   :  { %3205 = vmatprep.subr.bf16.mxu0 %v4608_v20  ;;  %3533 = vmatprep.subr.bf16.mxu1 %v4611_v21  ;;  %v4690_v20 = vld [vmem:[#allocation2 + $0x440] ss:$16 sps:$4 sm:$0xff]   ;;  %v4693_v21 = vld [vmem:[#allocation2 + $0x448] ss:$16 sps:$4 sm:$0xff]  }
  0x88   :  { %3206 = vmatpush1.bf16.msra.mxu0 %v4606_v22  ;;  %3534 = vmatpush1.bf16.msra.mxu1 %v4609_v23  ;;  %v4698_v22 = vld [vmem:[#allocation2 + $0x464] ss:$16 sps:$4 sm:$0xff]   ;;  %v4701_v23 = vld [vmem:[#allocation2 + $0x46c] ss:$16 sps:$4 sm:$0xff]  }
  0x89   :  { %3207 = vmatprep.subr.bf16.mxu0 %v4614_v24  ;;  %3535 = vmatprep.subr.bf16.mxu1 %v4617_v25  ;;  %v4696_v24 = vld [vmem:[#allocation2 + $0x460] ss:$16 sps:$4 sm:$0xff]   ;;  %v4699_v25 = vld [vmem:[#allocation2 + $0x468] ss:$16 sps:$4 sm:$0xff]  }
  0x8c   :  { %3208 = vmatpush1.bf16.msra.mxu0 %v4612_v26  ;;  %3536 = vmatpush1.bf16.msra.mxu1 %v4615_v27  ;;  %v4704_v26 = vld [vmem:[#allocation2 + $0x484] ss:$16 sps:$4 sm:$0xff]   ;;  %v4707_v27 = vld [vmem:[#allocation2 + $0x48c] ss:$16 sps:$4 sm:$0xff]  }
  0x8d   :  { %3209 = vmatprep.subr.bf16.mxu0 %v4620_v28  ;;  %3537 = vmatprep.subr.bf16.mxu1 %v4623_v29  ;;  %v4702_v28 = vld [vmem:[#allocation2 + $0x480] ss:$16 sps:$4 sm:$0xff]   ;;  %v4705_v29 = vld [vmem:[#allocation2 + $0x488] ss:$16 sps:$4 sm:$0xff]  }
  0x90   :  { %3210 = vmatpush1.bf16.msra.mxu0 %v4618_v31  ;;  %3538 = vmatpush1.bf16.msra.mxu1 %v4621_v33  ;;  %v4713_v31 = vld [vmem:[#allocation2 + $0x4ac] ss:$16 sps:$4 sm:$0xff]   ;;  %v4711_v33 = vld [vmem:[#allocation2 + $0x4a8] ss:$16 sps:$4 sm:$0xff]  }
  0x91   :  { %3211 = vmatprep.subr.bf16.mxu0 %v4626_v34  ;;  %3539 = vmatprep.subr.bf16.mxu1 %v4629_v35  ;;  %v4716_v34 = vld [vmem:[#allocation2 + $0x4c4] ss:$16 sps:$4 sm:$0xff]   ;;  %v4719_v35 = vld [vmem:[#allocation2 + $0x4cc] ss:$16 sps:$4 sm:$0xff]  }
  0x94   :  { %3212 = vmatpush1.bf16.msra.mxu0 %v4624_v36  ;;  %3540 = vmatpush1.bf16.msra.mxu1 %v4627_v37  ;;  %v4714_v36 = vld [vmem:[#allocation2 + $0x4c0] ss:$16 sps:$4 sm:$0xff]   ;;  %v4717_v37 = vld [vmem:[#allocation2 + $0x4c8] ss:$16 sps:$4 sm:$0xff]  }
  0x95   :  { %3213 = vmatprep.subr.bf16.mxu0 %v4632_v38  ;;  %3541 = vmatprep.subr.bf16.mxu1 %v4635_v39  ;;  %v4722_v38 = vld [vmem:[#allocation2 + $0x4e4] ss:$16 sps:$4 sm:$0xff]   ;;  %v4725_v39 = vld [vmem:[#allocation2 + $0x4ec] ss:$16 sps:$4 sm:$0xff]  }
  0x98   :  { %3214 = vmatpush1.bf16.msra.mxu0 %v4630_v40  ;;  %3542 = vmatpush1.bf16.msra.mxu1 %v4633_v41  ;;  %v4720_v40 = vld [vmem:[#allocation2 + $0x4e0] ss:$16 sps:$4 sm:$0xff]   ;;  %v4723_v41 = vld [vmem:[#allocation2 + $0x4e8] ss:$16 sps:$4 sm:$0xff]  }
  0x99   :  { %3215 = vmatprep.subr.bf16.mxu0 %v4638_v42  ;;  %3543 = vmatprep.subr.bf16.mxu1 %v4641_v43  ;;  %v4728_v42 = vld [vmem:[#allocation2 + $0x504] ss:$16 sps:$4 sm:$0xff]   ;;  %v4731_v43 = vld [vmem:[#allocation2 + $0x50c] ss:$16 sps:$4 sm:$0xff]  }
  0x9c   :  { %3216 = vmatpush1.bf16.msra.mxu0 %v4636_v44  ;;  %3544 = vmatpush1.bf16.msra.mxu1 %v4639_v45  ;;  %v4726_v44 = vld [vmem:[#allocation2 + $0x500] ss:$16 sps:$4 sm:$0xff]   ;;  %v4729_v45 = vld [vmem:[#allocation2 + $0x508] ss:$16 sps:$4 sm:$0xff]  }
  0x9d   :  { %3217 = vmatprep.subr.bf16.mxu0 %v4644_v46  ;;  %3545 = vmatprep.subr.bf16.mxu1 %v4647_v47  ;;  %v4734_v46 = vld [vmem:[#allocation2 + $0x524] ss:$16 sps:$4 sm:$0xff]   ;;  %v4737_v47 = vld [vmem:[#allocation2 + $0x52c] ss:$16 sps:$4 sm:$0xff]  }
  0xa0   :  { %3218 = vmatpush1.bf16.msra.mxu0 %v4642_v48  ;;  %3546 = vmatpush1.bf16.msra.mxu1 %v4645_v49  ;;  %v4732_v48 = vld [vmem:[#allocation2 + $0x520] ss:$16 sps:$4 sm:$0xff]   ;;  %v4735_v49 = vld [vmem:[#allocation2 + $0x528] ss:$16 sps:$4 sm:$0xff]  }
  0xa1   :  { %3219 = vmatprep.subr.bf16.mxu0 %v4650_v50  ;;  %3547 = vmatprep.subr.bf16.mxu1 %v4653_v51  ;;  %v4740_v50 = vld [vmem:[#allocation2 + $0x544] ss:$16 sps:$4 sm:$0xff]   ;;  %v4743_v51 = vld [vmem:[#allocation2 + $0x54c] ss:$16 sps:$4 sm:$0xff]  }
  0xa4   :  { %3220 = vmatpush1.bf16.msra.mxu0 %v4648_v52  ;;  %3548 = vmatpush1.bf16.msra.mxu1 %v4651_v53  ;;  %v4738_v52 = vld [vmem:[#allocation2 + $0x540] ss:$16 sps:$4 sm:$0xff]   ;;  %v4741_v53 = vld [vmem:[#allocation2 + $0x548] ss:$16 sps:$4 sm:$0xff]  }
  0xa5   :  { %3221 = vmatprep.subr.bf16.mxu0 %v4656_v54  ;;  %3549 = vmatprep.subr.bf16.mxu1 %v4659_v55  ;;  %v4746_v54 = vld [vmem:[#allocation2 + $0x564] ss:$16 sps:$4 sm:$0xff]   ;;  %v4749_v55 = vld [vmem:[#allocation2 + $0x56c] ss:$16 sps:$4 sm:$0xff]  }
  0xa8   :  { %3222 = vmatpush1.bf16.msra.mxu0 %v4654_v56  ;;  %3550 = vmatpush1.bf16.msra.mxu1 %v4657_v57  ;;  %v4744_v56 = vld [vmem:[#allocation2 + $0x560] ss:$16 sps:$4 sm:$0xff]   ;;  %v4747_v57 = vld [vmem:[#allocation2 + $0x568] ss:$16 sps:$4 sm:$0xff]  }
  0xa9   :  { %3223 = vmatprep.subr.bf16.mxu0 %v4662_v58  ;;  %3551 = vmatprep.subr.bf16.mxu1 %v4665_v59  ;;  %v4752_v58 = vld [vmem:[#allocation2 + $0x584] ss:$16 sps:$4 sm:$0xff]   ;;  %v4755_v59 = vld [vmem:[#allocation2 + $0x58c] ss:$16 sps:$4 sm:$0xff]  }
  0xac   :  { %3224 = vmatpush1.bf16.msra.mxu0 %v4660_v60  ;;  %3552 = vmatpush1.bf16.msra.mxu1 %v4663_v61  ;;  %v4750_v60 = vld [vmem:[#allocation2 + $0x580] ss:$16 sps:$4 sm:$0xff]   ;;  %v4753_v61 = vld [vmem:[#allocation2 + $0x588] ss:$16 sps:$4 sm:$0xff]  }
  0xad   :  { %3225 = vmatprep.subr.bf16.mxu0 %v4668_v62  ;;  %3553 = vmatprep.subr.bf16.mxu1 %v4671_v63  ;;  %v4758_v62 = vld [vmem:[#allocation2 + $0x5a4] ss:$16 sps:$4 sm:$0xff]   ;;  %v4761_v63 = vld [vmem:[#allocation2 + $0x5ac] ss:$16 sps:$4 sm:$0xff]  }
  0xb0   :  { %3226 = vmatpush1.bf16.msra.mxu0 %v4666_v0  ;;  %3554 = vmatpush1.bf16.msra.mxu1 %v4669_v1  ;;  %v4756_v0 = vld [vmem:[#allocation2 + $0x5a0] ss:$16 sps:$4 sm:$0xff]   ;;  %v4759_v1 = vld [vmem:[#allocation2 + $0x5a8] ss:$16 sps:$4 sm:$0xff]  }
  0xb1   :  { %3227 = vmatprep.subr.bf16.mxu0 %v4674_v2  ;;  %3555 = vmatprep.subr.bf16.mxu1 %v4677_v3  ;;  %v4764_v2 = vld [vmem:[#allocation2 + $0x5c4] ss:$16 sps:$4 sm:$0xff]   ;;  %v4767_v3 = vld [vmem:[#allocation2 + $0x5cc] ss:$16 sps:$4 sm:$0xff]  }
  0xb4   :  { %3228 = vmatpush1.bf16.msra.mxu0 %v4672_v4  ;;  %3556 = vmatpush1.bf16.msra.mxu1 %v4675_v5  ;;  %v4762_v4 = vld [vmem:[#allocation2 + $0x5c0] ss:$16 sps:$4 sm:$0xff]   ;;  %v4765_v5 = vld [vmem:[#allocation2 + $0x5c8] ss:$16 sps:$4 sm:$0xff]  }
  0xb5   :  { %3238 = vmatprep.subr.bf16.mxu0 %v4680_v6  ;;  %3566 = vmatprep.subr.bf16.mxu1 %v4683_v8  ;;  %v4770_v6 = vld [vmem:[#allocation2 + $0x5e4] ss:$16 sps:$4 sm:$0xff]   ;;  %v4768_v8 = vld [vmem:[#allocation2 + $0x5e0] ss:$16 sps:$4 sm:$0xff]  }
  0xb7   :  { %3230 = vmatmul.mubr.bf16.vlgmr.msra.gmra.mrb[0].mxu0 %v70_v11  ;;  %3558 = vmatmul.mubr.bf16.vlgmr.msra.gmra.mrb[0].mxu1 %v70_v11  ;;  %v56_v11 = vld [vmem:[#allocation7 + $0x20] sm:$0xff] }
  0xb8   :  { %3239 = vmatpush1.bf16.msra.mxu0 %v4678_v9  ;;  %3567 = vmatpush1.bf16.msra.mxu1 %v4681_v10  ;;  %v4771_v9 = vld [vmem:[#allocation2 + $0x5e8] ss:$16 sps:$4 sm:$0xff]   ;;  %v4776_v10 = vld [vmem:[#allocation2 + $0x604] ss:$16 sps:$4 sm:$0xff]  }
  0xb9   :  { %3240 = vmatprep.subr.bf16.mxu0 %v4686_v12  ;;  %3568 = vmatprep.subr.bf16.mxu1 %v4689_v13  ;;  %v4779_v12 = vld [vmem:[#allocation2 + $0x60c] ss:$16 sps:$4 sm:$0xff]   ;;  %v4774_v13 = vld [vmem:[#allocation2 + $0x600] ss:$16 sps:$4 sm:$0xff]  }
  0xba   :  { %3270 = vmatprep.mubr.bf16.mxu0 %v73_v15  ;;  %3598 = vmatprep.mubr.bf16.mxu1 %v73_v15  ;;  %v72_v15 = vpack.c.bf16 %v56_v11, %v56_v11  ;;  %v4869_v11 = vld [vmem:[#allocation2 + $0x7ec] ss:$16 sps:$4 sm:$0xff]  }
  0xbc   :  { %3241 = vmatpush1.bf16.msra.mxu0 %v4684_v16  ;;  %3569 = vmatpush1.bf16.msra.mxu1 %v4687_v17  ;;  %v59_v16 = vld [vmem:[#allocation7 + $0x38] sm:$0xff]  ;;  %v4782_v17 = vld [vmem:[#allocation2 + $0x624] ss:$16 sps:$4 sm:$0xff]  }
  0xbd   :  { %3242 = vmatprep.subr.bf16.mxu0 %v4692_v18  ;;  %3570 = vmatprep.subr.bf16.mxu1 %v4695_v19  ;;  %v4785_v18 = vld [vmem:[#allocation2 + $0x62c] ss:$16 sps:$4 sm:$0xff]   ;;  %v75_v19 = vpack.c.bf16 %v59_v16, %v59_v16 }
  0xbe   :  { %v4875_v16 = vld [vmem:[#allocation2 + $0x80c] ss:$16 sps:$4 sm:$0xff]  }
  0xc0   :  { %3243 = vmatpush1.bf16.msra.mxu0 %v4690_v20  ;;  %3571 = vmatpush1.bf16.msra.mxu1 %v4693_v21  ;;  %v4780_v20 = vld [vmem:[#allocation2 + $0x620] ss:$16 sps:$4 sm:$0xff]   ;;  %v4783_v21 = vld [vmem:[#allocation2 + $0x628] ss:$16 sps:$4 sm:$0xff]  }
  0xc1   :  { %3244 = vmatprep.subr.bf16.mxu0 %v4698_v22  ;;  %3572 = vmatprep.subr.bf16.mxu1 %v4701_v23  ;;  %v4788_v22 = vld [vmem:[#allocation2 + $0x644] ss:$16 sps:$4 sm:$0xff]   ;;  %v4791_v23 = vld [vmem:[#allocation2 + $0x64c] ss:$16 sps:$4 sm:$0xff]  }
  0xc4   :  { %3245 = vmatpush1.bf16.msra.mxu0 %v4696_v24  ;;  %3573 = vmatpush1.bf16.msra.mxu1 %v4699_v25  ;;  %v4786_v24 = vld [vmem:[#allocation2 + $0x640] ss:$16 sps:$4 sm:$0xff]   ;;  %v4789_v25 = vld [vmem:[#allocation2 + $0x648] ss:$16 sps:$4 sm:$0xff]  }
  0xc5   :  { %3246 = vmatprep.subr.bf16.mxu0 %v4704_v26  ;;  %3574 = vmatprep.subr.bf16.mxu1 %v4707_v27  ;;  %v4794_v26 = vld [vmem:[#allocation2 + $0x664] ss:$16 sps:$4 sm:$0xff]   ;;  %v4797_v27 = vld [vmem:[#allocation2 + $0x66c] ss:$16 sps:$4 sm:$0xff]  }
  0xc8   :  { %3247 = vmatpush1.bf16.msra.mxu0 %v4702_v28  ;;  %3575 = vmatpush1.bf16.msra.mxu1 %v4705_v29  ;;  %v4792_v28 = vld [vmem:[#allocation2 + $0x660] ss:$16 sps:$4 sm:$0xff]   ;;  %v4795_v29 = vld [vmem:[#allocation2 + $0x668] ss:$16 sps:$4 sm:$0xff]  }
  0xc9   :  { %3248 = vmatprep.subr.bf16.mxu0 %v4710_v30  ;;  %3576 = vmatprep.subr.bf16.mxu1 %v4713_v31  ;;  %v4800_v30 = vld [vmem:[#allocation2 + $0x684] ss:$16 sps:$4 sm:$0xff]   ;;  %v4803_v31 = vld [vmem:[#allocation2 + $0x68c] ss:$16 sps:$4 sm:$0xff]  }
  0xcc   :  { %3249 = vmatpush1.bf16.msra.mxu0 %v4708_v32  ;;  %3577 = vmatpush1.bf16.msra.mxu1 %v4711_v33  ;;  %v4798_v32 = vld [vmem:[#allocation2 + $0x680] ss:$16 sps:$4 sm:$0xff]   ;;  %v4801_v33 = vld [vmem:[#allocation2 + $0x688] ss:$16 sps:$4 sm:$0xff]  }
  0xcd   :  { %3250 = vmatprep.subr.bf16.mxu0 %v4716_v34  ;;  %3578 = vmatprep.subr.bf16.mxu1 %v4719_v35  ;;  %v4806_v34 = vld [vmem:[#allocation2 + $0x6a4] ss:$16 sps:$4 sm:$0xff]   ;;  %v4809_v35 = vld [vmem:[#allocation2 + $0x6ac] ss:$16 sps:$4 sm:$0xff]  }
  0xd0   :  { %3251 = vmatpush1.bf16.msra.mxu0 %v4714_v36  ;;  %3579 = vmatpush1.bf16.msra.mxu1 %v4717_v37  ;;  %v4804_v36 = vld [vmem:[#allocation2 + $0x6a0] ss:$16 sps:$4 sm:$0xff]   ;;  %v4807_v37 = vld [vmem:[#allocation2 + $0x6a8] ss:$16 sps:$4 sm:$0xff]  }
  0xd1   :  { %3252 = vmatprep.subr.bf16.mxu0 %v4722_v38  ;;  %3580 = vmatprep.subr.bf16.mxu1 %v4725_v39  ;;  %v4812_v38 = vld [vmem:[#allocation2 + $0x6c4] ss:$16 sps:$4 sm:$0xff]   ;;  %v4815_v39 = vld [vmem:[#allocation2 + $0x6cc] ss:$16 sps:$4 sm:$0xff]  }
  0xd4   :  { %3253 = vmatpush1.bf16.msra.mxu0 %v4720_v40  ;;  %3581 = vmatpush1.bf16.msra.mxu1 %v4723_v41  ;;  %v4810_v40 = vld [vmem:[#allocation2 + $0x6c0] ss:$16 sps:$4 sm:$0xff]   ;;  %v4813_v41 = vld [vmem:[#allocation2 + $0x6c8] ss:$16 sps:$4 sm:$0xff]  }
  0xd5   :  { %3254 = vmatprep.subr.bf16.mxu0 %v4728_v42  ;;  %3582 = vmatprep.subr.bf16.mxu1 %v4731_v43  ;;  %v4818_v42 = vld [vmem:[#allocation2 + $0x6e4] ss:$16 sps:$4 sm:$0xff]   ;;  %v4821_v43 = vld [vmem:[#allocation2 + $0x6ec] ss:$16 sps:$4 sm:$0xff]  }
  0xd8   :  { %3255 = vmatpush1.bf16.msra.mxu0 %v4726_v44  ;;  %3583 = vmatpush1.bf16.msra.mxu1 %v4729_v45  ;;  %v4816_v44 = vld [vmem:[#allocation2 + $0x6e0] ss:$16 sps:$4 sm:$0xff]   ;;  %v4819_v45 = vld [vmem:[#allocation2 + $0x6e8] ss:$16 sps:$4 sm:$0xff]  }
  0xd9   :  { %3256 = vmatprep.subr.bf16.mxu0 %v4734_v46  ;;  %3584 = vmatprep.subr.bf16.mxu1 %v4737_v47  ;;  %v4824_v46 = vld [vmem:[#allocation2 + $0x704] ss:$16 sps:$4 sm:$0xff]   ;;  %v4827_v47 = vld [vmem:[#allocation2 + $0x70c] ss:$16 sps:$4 sm:$0xff]  }
  0xdc   :  { %3257 = vmatpush1.bf16.msra.mxu0 %v4732_v48  ;;  %3585 = vmatpush1.bf16.msra.mxu1 %v4735_v49  ;;  %v4822_v48 = vld [vmem:[#allocation2 + $0x700] ss:$16 sps:$4 sm:$0xff]   ;;  %v4825_v49 = vld [vmem:[#allocation2 + $0x708] ss:$16 sps:$4 sm:$0xff]  }
  0xdd   :  { %3258 = vmatprep.subr.bf16.mxu0 %v4740_v50  ;;  %3586 = vmatprep.subr.bf16.mxu1 %v4743_v51  ;;  %v4830_v50 = vld [vmem:[#allocation2 + $0x724] ss:$16 sps:$4 sm:$0xff]   ;;  %v4833_v51 = vld [vmem:[#allocation2 + $0x72c] ss:$16 sps:$4 sm:$0xff]  }
  0xe0   :  { %3259 = vmatpush1.bf16.msra.mxu0 %v4738_v52  ;;  %3587 = vmatpush1.bf16.msra.mxu1 %v4741_v53  ;;  %v4828_v52 = vld [vmem:[#allocation2 + $0x720] ss:$16 sps:$4 sm:$0xff]   ;;  %v4831_v53 = vld [vmem:[#allocation2 + $0x728] ss:$16 sps:$4 sm:$0xff]  }
  0xe1   :  { %3260 = vmatprep.subr.bf16.mxu0 %v4746_v54  ;;  %3588 = vmatprep.subr.bf16.mxu1 %v4749_v55  ;;  %v4836_v54 = vld [vmem:[#allocation2 + $0x744] ss:$16 sps:$4 sm:$0xff]   ;;  %v4839_v55 = vld [vmem:[#allocation2 + $0x74c] ss:$16 sps:$4 sm:$0xff]  }
  0xe4   :  { %3261 = vmatpush1.bf16.msra.mxu0 %v4744_v56  ;;  %3589 = vmatpush1.bf16.msra.mxu1 %v4747_v57  ;;  %v4834_v56 = vld [vmem:[#allocation2 + $0x740] ss:$16 sps:$4 sm:$0xff]   ;;  %v4837_v57 = vld [vmem:[#allocation2 + $0x748] ss:$16 sps:$4 sm:$0xff]  }
  0xe5   :  { %3262 = vmatprep.subr.bf16.mxu0 %v4752_v58  ;;  %3590 = vmatprep.subr.bf16.mxu1 %v4755_v59  ;;  %v4842_v58 = vld [vmem:[#allocation2 + $0x764] ss:$16 sps:$4 sm:$0xff]   ;;  %v4845_v59 = vld [vmem:[#allocation2 + $0x76c] ss:$16 sps:$4 sm:$0xff]  }
  0xe8   :  { %3263 = vmatpush1.bf16.msra.mxu0 %v4750_v60  ;;  %3591 = vmatpush1.bf16.msra.mxu1 %v4753_v61  ;;  %v4840_v60 = vld [vmem:[#allocation2 + $0x760] ss:$16 sps:$4 sm:$0xff]   ;;  %v4843_v61 = vld [vmem:[#allocation2 + $0x768] ss:$16 sps:$4 sm:$0xff]  }
  0xe9   :  { %3264 = vmatprep.subr.bf16.mxu0 %v4758_v62  ;;  %3592 = vmatprep.subr.bf16.mxu1 %v4761_v63  ;;  %v4848_v62 = vld [vmem:[#allocation2 + $0x784] ss:$16 sps:$4 sm:$0xff]   ;;  %v4851_v63 = vld [vmem:[#allocation2 + $0x78c] ss:$16 sps:$4 sm:$0xff]  }
  0xec   :  { %3265 = vmatpush1.bf16.msra.mxu0 %v4756_v0  ;;  %3593 = vmatpush1.bf16.msra.mxu1 %v4759_v1  ;;  %v4846_v0 = vld [vmem:[#allocation2 + $0x780] ss:$16 sps:$4 sm:$0xff]   ;;  %v4849_v1 = vld [vmem:[#allocation2 + $0x788] ss:$16 sps:$4 sm:$0xff]  }
  0xed   :  { %3266 = vmatprep.subr.bf16.mxu0 %v4764_v2  ;;  %3594 = vmatprep.subr.bf16.mxu1 %v4767_v3  ;;  %v4854_v2 = vld [vmem:[#allocation2 + $0x7a4] ss:$16 sps:$4 sm:$0xff]   ;;  %v4857_v3 = vld [vmem:[#allocation2 + $0x7ac] ss:$16 sps:$4 sm:$0xff]  }
  0xf0   :  { %3267 = vmatpush1.bf16.msra.mxu0 %v4762_v4  ;;  %3595 = vmatpush1.bf16.msra.mxu1 %v4765_v5  ;;  %v4852_v4 = vld [vmem:[#allocation2 + $0x7a0] ss:$16 sps:$4 sm:$0xff]   ;;  %v4855_v5 = vld [vmem:[#allocation2 + $0x7a8] ss:$16 sps:$4 sm:$0xff]  }
  0xf1   :  { %3268 = vmatprep.subr.bf16.mxu0 %v4770_v6  ;;  %3596 = vmatprep.subr.bf16.mxu1 %v4773_v7  ;;  %v4860_v6 = vld [vmem:[#allocation2 + $0x7c4] ss:$16 sps:$4 sm:$0xff]   ;;  %v4863_v7 = vld [vmem:[#allocation2 + $0x7cc] ss:$16 sps:$4 sm:$0xff]  }
  0xf4   :  { %3269 = vmatpush1.bf16.msra.mxu0 %v4768_v8  ;;  %3597 = vmatpush1.bf16.msra.mxu1 %v4771_v9  ;;  %v4858_v8 = vld [vmem:[#allocation2 + $0x7c0] ss:$16 sps:$4 sm:$0xff]   ;;  %v4861_v9 = vld [vmem:[#allocation2 + $0x7c8] ss:$16 sps:$4 sm:$0xff]  }
  0xf5   :  { %3279 = vmatprep.subr.bf16.mxu0 %v4776_v10  ;;  %3607 = vmatprep.subr.bf16.mxu1 %v4779_v12  ;;  %v4866_v10 = vld [vmem:[#allocation2 + $0x7e4] ss:$16 sps:$4 sm:$0xff]   ;;  %v4864_v12 = vld [vmem:[#allocation2 + $0x7e0] ss:$16 sps:$4 sm:$0xff]  }
  0xf7   :  { %3271 = vmatmul.mubr.bf16.vlgmr.msra.gmra.mrb[0].mxu0 %v72_v15  ;;  %3599 = vmatmul.mubr.bf16.vlgmr.msra.gmra.mrb[0].mxu1 %v72_v15  ;;  %v4872_v15 = vld [vmem:[#allocation2 + $0x804] ss:$16 sps:$4 sm:$0xff]  }
  0xf8   :  { %3280 = vmatpush1.bf16.msra.mxu0 %v4774_v13  ;;  %3608 = vmatpush1.bf16.msra.mxu1 %v4777_v14  ;;  %v4867_v13 = vld [vmem:[#allocation2 + $0x7e8] ss:$16 sps:$4 sm:$0xff]  }
  0xf9   :  { %3281 = vmatprep.subr.bf16.mxu0 %v4782_v17  ;;  %3609 = vmatprep.subr.bf16.mxu1 %v4785_v18  ;;  %v58_v14 = vld [vmem:[#allocation7 + $0x30] sm:$0xff]  ;;  %v61_v18 = vld [vmem:[#allocation7 + $0x48] sm:$0xff] }
  0xfa   :  { %3311 = vmatprep.mubr.bf16.mxu0 %v75_v19  ;;  %3639 = vmatprep.mubr.bf16.mxu1 %v75_v19  ;;  %v74_v17 = vpack.c.bf16 %v58_v14, %v58_v14  ;;  %v4870_v19 = vld [vmem:[#allocation2 + $0x800] ss:$16 sps:$4 sm:$0xff]   ;;  %v4962_v14 = vld [vmem:[#allocation2 + $0x9e4] ss:$16 sps:$4 sm:$0xff]  }
  0xfc   :  { %3282 = vmatpush1.bf16.msra.mxu0 %v4780_v20  ;;  %3610 = vmatpush1.bf16.msra.mxu1 %v4783_v21  ;;  %v4873_v20 = vld [vmem:[#allocation2 + $0x808] ss:$16 sps:$4 sm:$0xff]   ;;  %v4878_v21 = vld [vmem:[#allocation2 + $0x824] ss:$16 sps:$4 sm:$0xff]  }
  0xfd   :  { %3283 = vmatprep.subr.bf16.mxu0 %v4788_v22  ;;  %3611 = vmatprep.subr.bf16.mxu1 %v4791_v23  ;;  %v4881_v22 = vld [vmem:[#allocation2 + $0x82c] ss:$16 sps:$4 sm:$0xff]   ;;  %v77_v23 = vpack.c.bf16 %v61_v18, %v61_v18  ;;  %v4968_v18 = vld [vmem:[#allocation2 + $0xa04] ss:$16 sps:$4 sm:$0xff]  }
 0x100   :  { %3284 = vmatpush1.bf16.msra.mxu0 %v4786_v24  ;;  %3612 = vmatpush1.bf16.msra.mxu1 %v4789_v25  ;;  %v4876_v24 = vld [vmem:[#allocation2 + $0x820] ss:$16 sps:$4 sm:$0xff]   ;;  %v4879_v25 = vld [vmem:[#allocation2 + $0x828] ss:$16 sps:$4 sm:$0xff]  }
 0x101   :  { %3285 = vmatprep.subr.bf16.mxu0 %v4794_v26  ;;  %3613 = vmatprep.subr.bf16.mxu1 %v4797_v27  ;;  %v4884_v26 = vld [vmem:[#allocation2 + $0x844] ss:$16 sps:$4 sm:$0xff]   ;;  %v4887_v27 = vld [vmem:[#allocation2 + $0x84c] ss:$16 sps:$4 sm:$0xff]  }
 0x104   :  { %3286 = vmatpush1.bf16.msra.mxu0 %v4792_v28  ;;  %3614 = vmatpush1.bf16.msra.mxu1 %v4795_v29  ;;  %v4882_v28 = vld [vmem:[#allocation2 + $0x840] ss:$16 sps:$4 sm:$0xff]   ;;  %v4885_v29 = vld [vmem:[#allocation2 + $0x848] ss:$16 sps:$4 sm:$0xff]  }
 0x105   :  { %3287 = vmatprep.subr.bf16.mxu0 %v4800_v30  ;;  %3615 = vmatprep.subr.bf16.mxu1 %v4803_v31  ;;  %v4890_v30 = vld [vmem:[#allocation2 + $0x864] ss:$16 sps:$4 sm:$0xff]   ;;  %v4893_v31 = vld [vmem:[#allocation2 + $0x86c] ss:$16 sps:$4 sm:$0xff]  }
 0x108   :  { %3288 = vmatpush1.bf16.msra.mxu0 %v4798_v32  ;;  %3616 = vmatpush1.bf16.msra.mxu1 %v4801_v33  ;;  %v4888_v32 = vld [vmem:[#allocation2 + $0x860] ss:$16 sps:$4 sm:$0xff]   ;;  %v4891_v33 = vld [vmem:[#allocation2 + $0x868] ss:$16 sps:$4 sm:$0xff]  }
 0x109   :  { %3289 = vmatprep.subr.bf16.mxu0 %v4806_v34  ;;  %3617 = vmatprep.subr.bf16.mxu1 %v4809_v35  ;;  %v4896_v34 = vld [vmem:[#allocation2 + $0x884] ss:$16 sps:$4 sm:$0xff]   ;;  %v4899_v35 = vld [vmem:[#allocation2 + $0x88c] ss:$16 sps:$4 sm:$0xff]  }
 0x10c   :  { %3290 = vmatpush1.bf16.msra.mxu0 %v4804_v36  ;;  %3618 = vmatpush1.bf16.msra.mxu1 %v4807_v37  ;;  %v4894_v36 = vld [vmem:[#allocation2 + $0x880] ss:$16 sps:$4 sm:$0xff]   ;;  %v4897_v37 = vld [vmem:[#allocation2 + $0x888] ss:$16 sps:$4 sm:$0xff]  }
 0x10d   :  { %3291 = vmatprep.subr.bf16.mxu0 %v4812_v38  ;;  %3619 = vmatprep.subr.bf16.mxu1 %v4815_v39  ;;  %v4902_v38 = vld [vmem:[#allocation2 + $0x8a4] ss:$16 sps:$4 sm:$0xff]   ;;  %v4905_v39 = vld [vmem:[#allocation2 + $0x8ac] ss:$16 sps:$4 sm:$0xff]  }
 0x110   :  { %3292 = vmatpush1.bf16.msra.mxu0 %v4810_v40  ;;  %3620 = vmatpush1.bf16.msra.mxu1 %v4813_v41  ;;  %v4900_v40 = vld [vmem:[#allocation2 + $0x8a0] ss:$16 sps:$4 sm:$0xff]   ;;  %v4903_v41 = vld [vmem:[#allocation2 + $0x8a8] ss:$16 sps:$4 sm:$0xff]  }
 0x111   :  { %3293 = vmatprep.subr.bf16.mxu0 %v4818_v42  ;;  %3621 = vmatprep.subr.bf16.mxu1 %v4821_v43  ;;  %v4908_v42 = vld [vmem:[#allocation2 + $0x8c4] ss:$16 sps:$4 sm:$0xff]   ;;  %v4911_v43 = vld [vmem:[#allocation2 + $0x8cc] ss:$16 sps:$4 sm:$0xff]  }
 0x114   :  { %3294 = vmatpush1.bf16.msra.mxu0 %v4816_v44  ;;  %3622 = vmatpush1.bf16.msra.mxu1 %v4819_v45  ;;  %v4906_v44 = vld [vmem:[#allocation2 + $0x8c0] ss:$16 sps:$4 sm:$0xff]   ;;  %v4909_v45 = vld [vmem:[#allocation2 + $0x8c8] ss:$16 sps:$4 sm:$0xff]  }
 0x115   :  { %3295 = vmatprep.subr.bf16.mxu0 %v4824_v46  ;;  %3623 = vmatprep.subr.bf16.mxu1 %v4827_v47  ;;  %v4914_v46 = vld [vmem:[#allocation2 + $0x8e4] ss:$16 sps:$4 sm:$0xff]   ;;  %v4917_v47 = vld [vmem:[#allocation2 + $0x8ec] ss:$16 sps:$4 sm:$0xff]  }
 0x118   :  { %3296 = vmatpush1.bf16.msra.mxu0 %v4822_v48  ;;  %3624 = vmatpush1.bf16.msra.mxu1 %v4825_v49  ;;  %v4912_v48 = vld [vmem:[#allocation2 + $0x8e0] ss:$16 sps:$4 sm:$0xff]   ;;  %v4915_v49 = vld [vmem:[#allocation2 + $0x8e8] ss:$16 sps:$4 sm:$0xff]  }
 0x119   :  { %3297 = vmatprep.subr.bf16.mxu0 %v4830_v50  ;;  %3625 = vmatprep.subr.bf16.mxu1 %v4833_v51  ;;  %v4920_v50 = vld [vmem:[#allocation2 + $0x904] ss:$16 sps:$4 sm:$0xff]   ;;  %v4923_v51 = vld [vmem:[#allocation2 + $0x90c] ss:$16 sps:$4 sm:$0xff]  }
 0x11c   :  { %3298 = vmatpush1.bf16.msra.mxu0 %v4828_v52  ;;  %3626 = vmatpush1.bf16.msra.mxu1 %v4831_v53  ;;  %v4918_v52 = vld [vmem:[#allocation2 + $0x900] ss:$16 sps:$4 sm:$0xff]   ;;  %v4921_v53 = vld [vmem:[#allocation2 + $0x908] ss:$16 sps:$4 sm:$0xff]  }
 0x11d   :  { %3299 = vmatprep.subr.bf16.mxu0 %v4836_v54  ;;  %3627 = vmatprep.subr.bf16.mxu1 %v4839_v55  ;;  %v4926_v54 = vld [vmem:[#allocation2 + $0x924] ss:$16 sps:$4 sm:$0xff]   ;;  %v4929_v55 = vld [vmem:[#allocation2 + $0x92c] ss:$16 sps:$4 sm:$0xff]  }
 0x120   :  { %3300 = vmatpush1.bf16.msra.mxu0 %v4834_v56  ;;  %3628 = vmatpush1.bf16.msra.mxu1 %v4837_v57  ;;  %v4924_v56 = vld [vmem:[#allocation2 + $0x920] ss:$16 sps:$4 sm:$0xff]   ;;  %v4927_v57 = vld [vmem:[#allocation2 + $0x928] ss:$16 sps:$4 sm:$0xff]  }
 0x121   :  { %3301 = vmatprep.subr.bf16.mxu0 %v4842_v58  ;;  %3629 = vmatprep.subr.bf16.mxu1 %v4845_v59  ;;  %v4932_v58 = vld [vmem:[#allocation2 + $0x944] ss:$16 sps:$4 sm:$0xff]   ;;  %v4935_v59 = vld [vmem:[#allocation2 + $0x94c] ss:$16 sps:$4 sm:$0xff]  }
 0x124   :  { %3302 = vmatpush1.bf16.msra.mxu0 %v4840_v60  ;;  %3630 = vmatpush1.bf16.msra.mxu1 %v4843_v61  ;;  %v4930_v60 = vld [vmem:[#allocation2 + $0x940] ss:$16 sps:$4 sm:$0xff]   ;;  %v4933_v61 = vld [vmem:[#allocation2 + $0x948] ss:$16 sps:$4 sm:$0xff]  }
 0x125   :  { %3303 = vmatprep.subr.bf16.mxu0 %v4848_v62  ;;  %3631 = vmatprep.subr.bf16.mxu1 %v4851_v63  ;;  %v4938_v62 = vld [vmem:[#allocation2 + $0x964] ss:$16 sps:$4 sm:$0xff]   ;;  %v4941_v63 = vld [vmem:[#allocation2 + $0x96c] ss:$16 sps:$4 sm:$0xff]  }
 0x128   :  { %3304 = vmatpush1.bf16.msra.mxu0 %v4846_v0  ;;  %3632 = vmatpush1.bf16.msra.mxu1 %v4849_v1  ;;  %v4936_v0 = vld [vmem:[#allocation2 + $0x960] ss:$16 sps:$4 sm:$0xff]   ;;  %v4939_v1 = vld [vmem:[#allocation2 + $0x968] ss:$16 sps:$4 sm:$0xff]  }
 0x129   :  { %3305 = vmatprep.subr.bf16.mxu0 %v4854_v2  ;;  %3633 = vmatprep.subr.bf16.mxu1 %v4857_v3  ;;  %v4944_v2 = vld [vmem:[#allocation2 + $0x984] ss:$16 sps:$4 sm:$0xff]   ;;  %v4947_v3 = vld [vmem:[#allocation2 + $0x98c] ss:$16 sps:$4 sm:$0xff]  }
 0x12c   :  { %3306 = vmatpush1.bf16.msra.mxu0 %v4852_v4  ;;  %3634 = vmatpush1.bf16.msra.mxu1 %v4855_v5  ;;  %v4942_v4 = vld [vmem:[#allocation2 + $0x980] ss:$16 sps:$4 sm:$0xff]   ;;  %v4945_v5 = vld [vmem:[#allocation2 + $0x988] ss:$16 sps:$4 sm:$0xff]  }
 0x12d   :  { %3307 = vmatprep.subr.bf16.mxu0 %v4860_v6  ;;  %3635 = vmatprep.subr.bf16.mxu1 %v4863_v7  ;;  %v4950_v6 = vld [vmem:[#allocation2 + $0x9a4] ss:$16 sps:$4 sm:$0xff]   ;;  %v4953_v7 = vld [vmem:[#allocation2 + $0x9ac] ss:$16 sps:$4 sm:$0xff]  }
 0x130   :  { %3308 = vmatpush1.bf16.msra.mxu0 %v4858_v8  ;;  %3636 = vmatpush1.bf16.msra.mxu1 %v4861_v9  ;;  %v4948_v8 = vld [vmem:[#allocation2 + $0x9a0] ss:$16 sps:$4 sm:$0xff]   ;;  %v4951_v9 = vld [vmem:[#allocation2 + $0x9a8] ss:$16 sps:$4 sm:$0xff]  }
 0x131   :  { %3309 = vmatprep.subr.bf16.mxu0 %v4866_v10  ;;  %3637 = vmatprep.subr.bf16.mxu1 %v4869_v11  ;;  %v4956_v10 = vld [vmem:[#allocation2 + $0x9c4] ss:$16 sps:$4 sm:$0xff]   ;;  %v4959_v11 = vld [vmem:[#allocation2 + $0x9cc] ss:$16 sps:$4 sm:$0xff]  }
 0x134   :  { %3310 = vmatpush1.bf16.msra.mxu0 %v4864_v12  ;;  %3638 = vmatpush1.bf16.msra.mxu1 %v4867_v13  ;;  %v4954_v12 = vld [vmem:[#allocation2 + $0x9c0] ss:$16 sps:$4 sm:$0xff]   ;;  %v4957_v13 = vld [vmem:[#allocation2 + $0x9c8] ss:$16 sps:$4 sm:$0xff]  }
 0x135   :  { %3320 = vmatprep.subr.bf16.mxu0 %v4872_v15  ;;  %3648 = vmatprep.subr.bf16.mxu1 %v4875_v16  ;;  %v4965_v15 = vld [vmem:[#allocation2 + $0x9ec] ss:$16 sps:$4 sm:$0xff]   ;;  %v4960_v16 = vld [vmem:[#allocation2 + $0x9e0] ss:$16 sps:$4 sm:$0xff]  }
 0x137   :  { %3312 = vmatmul.mubr.bf16.vlgmr.msra.gmra.mrb[0].mxu0 %v74_v17  ;;  %3640 = vmatmul.mubr.bf16.vlgmr.msra.gmra.mrb[0].mxu1 %v74_v17  ;;  %v4963_v17 = vld [vmem:[#allocation2 + $0x9e8] ss:$16 sps:$4 sm:$0xff]  }
 0x138   :  { %3321 = vmatpush1.bf16.msra.mxu0 %v4870_v19  ;;  %3649 = vmatpush1.bf16.msra.mxu1 %v4873_v20  ;;  %v5438_v19 = vld [vmem:[#allocation7 + $0x40] sm:$0xff]  ;;  %v4971_v20 = vld [vmem:[#allocation2 + $0xa0c] ss:$16 sps:$4 sm:$0xff]  }
 0x139   :  { %3322 = vmatprep.subr.bf16.mxu0 %v4878_v21  ;;  %3650 = vmatprep.subr.bf16.mxu1 %v4881_v22  ;;  %v5440_v21 = vld [vmem:[#allocation7 + $0x58] sm:$0xff]  ;;  %v76_v22 = vpack.c.bf16 %v5438_v19, %v5438_v19 }
 0x13a   :  { %3352 = vmatprep.mubr.bf16.mxu0 %v77_v23  ;;  %3680 = vmatprep.mubr.bf16.mxu1 %v77_v23  ;;  %v4966_v23 = vld [vmem:[#allocation2 + $0xa00] ss:$16 sps:$4 sm:$0xff]  }
 0x13c   :  { %3323 = vmatpush1.bf16.msra.mxu0 %v4876_v24  ;;  %3651 = vmatpush1.bf16.msra.mxu1 %v4879_v25  ;;  %v4969_v24 = vld [vmem:[#allocation2 + $0xa08] ss:$16 sps:$4 sm:$0xff]   ;;  %v4974_v25 = vld [vmem:[#allocation2 + $0xa24] ss:$16 sps:$4 sm:$0xff]  }
 0x13d   :  { %3324 = vmatprep.subr.bf16.mxu0 %v4884_v26  ;;  %3652 = vmatprep.subr.bf16.mxu1 %v4887_v27  ;;  %v4977_v26 = vld [vmem:[#allocation2 + $0xa2c] ss:$16 sps:$4 sm:$0xff]   ;;  %v79_v27 = vpack.c.bf16 %v5440_v21, %v5440_v21 }
 0x140   :  { %3325 = vmatpush1.bf16.msra.mxu0 %v4882_v28  ;;  %3653 = vmatpush1.bf16.msra.mxu1 %v4885_v29  ;;  %v4972_v28 = vld [vmem:[#allocation2 + $0xa20] ss:$16 sps:$4 sm:$0xff]   ;;  %v4975_v29 = vld [vmem:[#allocation2 + $0xa28] ss:$16 sps:$4 sm:$0xff]  }
 0x141   :  { %3326 = vmatprep.subr.bf16.mxu0 %v4890_v30  ;;  %3654 = vmatprep.subr.bf16.mxu1 %v4893_v31  ;;  %v4980_v30 = vld [vmem:[#allocation2 + $0xa44] ss:$16 sps:$4 sm:$0xff]   ;;  %v4983_v31 = vld [vmem:[#allocation2 + $0xa4c] ss:$16 sps:$4 sm:$0xff]  }
 0x144   :  { %3327 = vmatpush1.bf16.msra.mxu0 %v4888_v32  ;;  %3655 = vmatpush1.bf16.msra.mxu1 %v4891_v33  ;;  %v4978_v32 = vld [vmem:[#allocation2 + $0xa40] ss:$16 sps:$4 sm:$0xff]   ;;  %v4981_v33 = vld [vmem:[#allocation2 + $0xa48] ss:$16 sps:$4 sm:$0xff]  }
 0x145   :  { %3328 = vmatprep.subr.bf16.mxu0 %v4896_v34  ;;  %3656 = vmatprep.subr.bf16.mxu1 %v4899_v35  ;;  %v4986_v34 = vld [vmem:[#allocation2 + $0xa64] ss:$16 sps:$4 sm:$0xff]   ;;  %v4989_v35 = vld [vmem:[#allocation2 + $0xa6c] ss:$16 sps:$4 sm:$0xff]  }
 0x148   :  { %3329 = vmatpush1.bf16.msra.mxu0 %v4894_v36  ;;  %3657 = vmatpush1.bf16.msra.mxu1 %v4897_v37  ;;  %v4984_v36 = vld [vmem:[#allocation2 + $0xa60] ss:$16 sps:$4 sm:$0xff]   ;;  %v4987_v37 = vld [vmem:[#allocation2 + $0xa68] ss:$16 sps:$4 sm:$0xff]  }
 0x149   :  { %3330 = vmatprep.subr.bf16.mxu0 %v4902_v38  ;;  %3658 = vmatprep.subr.bf16.mxu1 %v4905_v39  ;;  %v4992_v38 = vld [vmem:[#allocation2 + $0xa84] ss:$16 sps:$4 sm:$0xff]   ;;  %v4995_v39 = vld [vmem:[#allocation2 + $0xa8c] ss:$16 sps:$4 sm:$0xff]  }
 0x14c   :  { %3331 = vmatpush1.bf16.msra.mxu0 %v4900_v40  ;;  %3659 = vmatpush1.bf16.msra.mxu1 %v4903_v41  ;;  %v4990_v40 = vld [vmem:[#allocation2 + $0xa80] ss:$16 sps:$4 sm:$0xff]   ;;  %v4993_v41 = vld [vmem:[#allocation2 + $0xa88] ss:$16 sps:$4 sm:$0xff]  }
 0x14d   :  { %3332 = vmatprep.subr.bf16.mxu0 %v4908_v42  ;;  %3660 = vmatprep.subr.bf16.mxu1 %v4911_v43  ;;  %v4998_v42 = vld [vmem:[#allocation2 + $0xaa4] ss:$16 sps:$4 sm:$0xff]   ;;  %v5001_v43 = vld [vmem:[#allocation2 + $0xaac] ss:$16 sps:$4 sm:$0xff]  }
 0x150   :  { %3333 = vmatpush1.bf16.msra.mxu0 %v4906_v44  ;;  %3661 = vmatpush1.bf16.msra.mxu1 %v4909_v45  ;;  %v4996_v44 = vld [vmem:[#allocation2 + $0xaa0] ss:$16 sps:$4 sm:$0xff]   ;;  %v4999_v45 = vld [vmem:[#allocation2 + $0xaa8] ss:$16 sps:$4 sm:$0xff]  }
 0x151   :  { %3334 = vmatprep.subr.bf16.mxu0 %v4914_v46  ;;  %3662 = vmatprep.subr.bf16.mxu1 %v4917_v47  ;;  %v5004_v46 = vld [vmem:[#allocation2 + $0xac4] ss:$16 sps:$4 sm:$0xff]   ;;  %v5007_v47 = vld [vmem:[#allocation2 + $0xacc] ss:$16 sps:$4 sm:$0xff]  }
 0x154   :  { %3335 = vmatpush1.bf16.msra.mxu0 %v4912_v48  ;;  %3663 = vmatpush1.bf16.msra.mxu1 %v4915_v49  ;;  %v5002_v48 = vld [vmem:[#allocation2 + $0xac0] ss:$16 sps:$4 sm:$0xff]   ;;  %v5005_v49 = vld [vmem:[#allocation2 + $0xac8] ss:$16 sps:$4 sm:$0xff]  }
 0x155   :  { %3336 = vmatprep.subr.bf16.mxu0 %v4920_v50  ;;  %3664 = vmatprep.subr.bf16.mxu1 %v4923_v51  ;;  %v5010_v50 = vld [vmem:[#allocation2 + $0xae4] ss:$16 sps:$4 sm:$0xff]   ;;  %v5013_v51 = vld [vmem:[#allocation2 + $0xaec] ss:$16 sps:$4 sm:$0xff]  }
 0x158   :  { %3337 = vmatpush1.bf16.msra.mxu0 %v4918_v52  ;;  %3665 = vmatpush1.bf16.msra.mxu1 %v4921_v53  ;;  %v5008_v52 = vld [vmem:[#allocation2 + $0xae0] ss:$16 sps:$4 sm:$0xff]   ;;  %v5011_v53 = vld [vmem:[#allocation2 + $0xae8] ss:$16 sps:$4 sm:$0xff]  }
 0x159   :  { %3338 = vmatprep.subr.bf16.mxu0 %v4926_v54  ;;  %3666 = vmatprep.subr.bf16.mxu1 %v4929_v55  ;;  %v5016_v54 = vld [vmem:[#allocation2 + $0xb04] ss:$16 sps:$4 sm:$0xff]   ;;  %v5019_v55 = vld [vmem:[#allocation2 + $0xb0c] ss:$16 sps:$4 sm:$0xff]  }
 0x15c   :  { %3339 = vmatpush1.bf16.msra.mxu0 %v4924_v56  ;;  %3667 = vmatpush1.bf16.msra.mxu1 %v4927_v57  ;;  %v5014_v56 = vld [vmem:[#allocation2 + $0xb00] ss:$16 sps:$4 sm:$0xff]   ;;  %v5017_v57 = vld [vmem:[#allocation2 + $0xb08] ss:$16 sps:$4 sm:$0xff]  }
 0x15d   :  { %3340 = vmatprep.subr.bf16.mxu0 %v4932_v58  ;;  %3668 = vmatprep.subr.bf16.mxu1 %v4935_v59  ;;  %v5022_v58 = vld [vmem:[#allocation2 + $0xb24] ss:$16 sps:$4 sm:$0xff]   ;;  %v5025_v59 = vld [vmem:[#allocation2 + $0xb2c] ss:$16 sps:$4 sm:$0xff]  }
 0x160   :  { %3341 = vmatpush1.bf16.msra.mxu0 %v4930_v60  ;;  %3669 = vmatpush1.bf16.msra.mxu1 %v4933_v61  ;;  %v5020_v60 = vld [vmem:[#allocation2 + $0xb20] ss:$16 sps:$4 sm:$0xff]   ;;  %v5023_v61 = vld [vmem:[#allocation2 + $0xb28] ss:$16 sps:$4 sm:$0xff]  }
 0x161   :  { %3342 = vmatprep.subr.bf16.mxu0 %v4938_v62  ;;  %3670 = vmatprep.subr.bf16.mxu1 %v4941_v63  ;;  %v5028_v62 = vld [vmem:[#allocation2 + $0xb44] ss:$16 sps:$4 sm:$0xff]   ;;  %v5031_v63 = vld [vmem:[#allocation2 + $0xb4c] ss:$16 sps:$4 sm:$0xff]  }
 0x164   :  { %3343 = vmatpush1.bf16.msra.mxu0 %v4936_v0  ;;  %3671 = vmatpush1.bf16.msra.mxu1 %v4939_v1  ;;  %v5026_v0 = vld [vmem:[#allocation2 + $0xb40] ss:$16 sps:$4 sm:$0xff]   ;;  %v5029_v1 = vld [vmem:[#allocation2 + $0xb48] ss:$16 sps:$4 sm:$0xff]  }
 0x165   :  { %3344 = vmatprep.subr.bf16.mxu0 %v4944_v2  ;;  %3672 = vmatprep.subr.bf16.mxu1 %v4947_v3  ;;  %v5034_v2 = vld [vmem:[#allocation2 + $0xb64] ss:$16 sps:$4 sm:$0xff]   ;;  %v5037_v3 = vld [vmem:[#allocation2 + $0xb6c] ss:$16 sps:$4 sm:$0xff]  }
 0x168   :  { %3345 = vmatpush1.bf16.msra.mxu0 %v4942_v4  ;;  %3673 = vmatpush1.bf16.msra.mxu1 %v4945_v5  ;;  %v5032_v4 = vld [vmem:[#allocation2 + $0xb60] ss:$16 sps:$4 sm:$0xff]   ;;  %v5035_v5 = vld [vmem:[#allocation2 + $0xb68] ss:$16 sps:$4 sm:$0xff]  }
 0x169   :  { %3346 = vmatprep.subr.bf16.mxu0 %v4950_v6  ;;  %3674 = vmatprep.subr.bf16.mxu1 %v4953_v7  ;;  %v5040_v6 = vld [vmem:[#allocation2 + $0xb84] ss:$16 sps:$4 sm:$0xff]   ;;  %v5043_v7 = vld [vmem:[#allocation2 + $0xb8c] ss:$16 sps:$4 sm:$0xff]  }
 0x16c   :  { %3347 = vmatpush1.bf16.msra.mxu0 %v4948_v8  ;;  %3675 = vmatpush1.bf16.msra.mxu1 %v4951_v9  ;;  %v5038_v8 = vld [vmem:[#allocation2 + $0xb80] ss:$16 sps:$4 sm:$0xff]   ;;  %v5041_v9 = vld [vmem:[#allocation2 + $0xb88] ss:$16 sps:$4 sm:$0xff]  }
 0x16d   :  { %3348 = vmatprep.subr.bf16.mxu0 %v4956_v10  ;;  %3676 = vmatprep.subr.bf16.mxu1 %v4959_v11  ;;  %v5046_v10 = vld [vmem:[#allocation2 + $0xba4] ss:$16 sps:$4 sm:$0xff]   ;;  %v5049_v11 = vld [vmem:[#allocation2 + $0xbac] ss:$16 sps:$4 sm:$0xff]  }
 0x170   :  { %3349 = vmatpush1.bf16.msra.mxu0 %v4954_v12  ;;  %3677 = vmatpush1.bf16.msra.mxu1 %v4957_v13  ;;  %v5044_v12 = vld [vmem:[#allocation2 + $0xba0] ss:$16 sps:$4 sm:$0xff]   ;;  %v5047_v13 = vld [vmem:[#allocation2 + $0xba8] ss:$16 sps:$4 sm:$0xff]  }
 0x171   :  { %3350 = vmatprep.subr.bf16.mxu0 %v4962_v14  ;;  %3678 = vmatprep.subr.bf16.mxu1 %v4965_v15  ;;  %v5052_v14 = vld [vmem:[#allocation2 + $0xbc4] ss:$16 sps:$4 sm:$0xff]   ;;  %v5055_v15 = vld [vmem:[#allocation2 + $0xbcc] ss:$16 sps:$4 sm:$0xff]  }
 0x174   :  { %3351 = vmatpush1.bf16.msra.mxu0 %v4960_v16  ;;  %3679 = vmatpush1.bf16.msra.mxu1 %v4963_v17  ;;  %v5050_v16 = vld [vmem:[#allocation2 + $0xbc0] ss:$16 sps:$4 sm:$0xff]   ;;  %v5053_v17 = vld [vmem:[#allocation2 + $0xbc8] ss:$16 sps:$4 sm:$0xff]  }
 0x175   :  { %3361 = vmatprep.subr.bf16.mxu0 %v4968_v18  ;;  %3689 = vmatprep.subr.bf16.mxu1 %v4971_v20  ;;  %v5058_v18 = vld [vmem:[#allocation2 + $0xbe4] ss:$16 sps:$4 sm:$0xff]   ;;  %v5061_v20 = vld [vmem:[#allocation2 + $0xbec] ss:$16 sps:$4 sm:$0xff]  }
 0x177   :  { %3353 = vmatmul.mubr.bf16.vlgmr.msra.gmra.mrb[0].mxu0 %v76_v22  ;;  %3681 = vmatmul.mubr.bf16.vlgmr.msra.gmra.mrb[0].mxu1 %v76_v22  ;;  %v5056_v22 = vld [vmem:[#allocation2 + $0xbe0] ss:$16 sps:$4 sm:$0xff]  }
 0x178   :  { %3362 = vmatpush1.bf16.msra.mxu0 %v4966_v23  ;;  %3690 = vmatpush1.bf16.msra.mxu1 %v4969_v24  ;;  %v5059_v23 = vld [vmem:[#allocation2 + $0xbe8] ss:$16 sps:$4 sm:$0xff]  }
 0x179   :  { %3363 = vmatprep.subr.bf16.mxu0 %v4974_v25  ;;  %3691 = vmatprep.subr.bf16.mxu1 %v4977_v26  ;;  %v5446_v24 = vld [vmem:[#allocation7 + $0x50] sm:$0xff]  ;;  %v5067_v26 = vld [vmem:[#allocation2 + $0xc0c] ss:$16 sps:$4 sm:$0xff]  }
 0x17a   :  { %3393 = vmatprep.mubr.bf16.mxu0 %v79_v27  ;;  %3721 = vmatprep.mubr.bf16.mxu1 %v79_v27  ;;  %v5064_v25 = vld [vmem:[#allocation2 + $0xc04] ss:$16 sps:$4 sm:$0xff]   ;;  %v78_v27 = vpack.c.bf16 %v5446_v24, %v5446_v24 }
 0x17c   :  { %3364 = vmatpush1.bf16.msra.mxu0 %v4972_v28  ;;  %3692 = vmatpush1.bf16.msra.mxu1 %v4975_v29  ;;  %v5450_v28 = vld [vmem:[#allocation7 + $0x68] sm:$0xff] }
 0x17d   :  { %3365 = vmatprep.subr.bf16.mxu0 %v4980_v30  ;;  %3693 = vmatprep.subr.bf16.mxu1 %v4983_v31  ;;  %v5062_v29 = vld [vmem:[#allocation2 + $0xc00] ss:$16 sps:$4 sm:$0xff]   ;;  %v5065_v30 = vld [vmem:[#allocation2 + $0xc08] ss:$16 sps:$4 sm:$0xff]   ;;  %v5070_v31 = vld [vmem:[#allocation2 + $0xc24] ss:$16 sps:$4 sm:$0xff]  }
 0x180   :  { %3366 = vmatpush1.bf16.msra.mxu0 %v4978_v32  ;;  %3694 = vmatpush1.bf16.msra.mxu1 %v4981_v33  ;;  %v5073_v32 = vld [vmem:[#allocation2 + $0xc2c] ss:$16 sps:$4 sm:$0xff]   ;;  %v81_v33 = vpack.c.bf16 %v5450_v28, %v5450_v28 }
 0x181   :  { %3367 = vmatprep.subr.bf16.mxu0 %v4986_v34  ;;  %3695 = vmatprep.subr.bf16.mxu1 %v4989_v35  ;;  %v5068_v34 = vld [vmem:[#allocation2 + $0xc20] ss:$16 sps:$4 sm:$0xff]   ;;  %v5071_v35 = vld [vmem:[#allocation2 + $0xc28] ss:$16 sps:$4 sm:$0xff]  }
 0x184   :  { %3368 = vmatpush1.bf16.msra.mxu0 %v4984_v36  ;;  %3696 = vmatpush1.bf16.msra.mxu1 %v4987_v37  ;;  %v5076_v36 = vld [vmem:[#allocation2 + $0xc44] ss:$16 sps:$4 sm:$0xff]   ;;  %v5079_v37 = vld [vmem:[#allocation2 + $0xc4c] ss:$16 sps:$4 sm:$0xff]  }
 0x185   :  { %3369 = vmatprep.subr.bf16.mxu0 %v4992_v38  ;;  %3697 = vmatprep.subr.bf16.mxu1 %v4995_v39  ;;  %v5074_v38 = vld [vmem:[#allocation2 + $0xc40] ss:$16 sps:$4 sm:$0xff]   ;;  %v5077_v39 = vld [vmem:[#allocation2 + $0xc48] ss:$16 sps:$4 sm:$0xff]  }
 0x188   :  { %3370 = vmatpush1.bf16.msra.mxu0 %v4990_v40  ;;  %3698 = vmatpush1.bf16.msra.mxu1 %v4993_v41  ;;  %v5082_v40 = vld [vmem:[#allocation2 + $0xc64] ss:$16 sps:$4 sm:$0xff]   ;;  %v5085_v41 = vld [vmem:[#allocation2 + $0xc6c] ss:$16 sps:$4 sm:$0xff]  }
 0x189   :  { %3371 = vmatprep.subr.bf16.mxu0 %v4998_v42  ;;  %3699 = vmatprep.subr.bf16.mxu1 %v5001_v43  ;;  %v5080_v42 = vld [vmem:[#allocation2 + $0xc60] ss:$16 sps:$4 sm:$0xff]   ;;  %v5083_v43 = vld [vmem:[#allocation2 + $0xc68] ss:$16 sps:$4 sm:$0xff]  }
 0x18c   :  { %3372 = vmatpush1.bf16.msra.mxu0 %v4996_v44  ;;  %3700 = vmatpush1.bf16.msra.mxu1 %v4999_v45  ;;  %v5088_v44 = vld [vmem:[#allocation2 + $0xc84] ss:$16 sps:$4 sm:$0xff]   ;;  %v5091_v45 = vld [vmem:[#allocation2 + $0xc8c] ss:$16 sps:$4 sm:$0xff]  }
 0x18d   :  { %3373 = vmatprep.subr.bf16.mxu0 %v5004_v46  ;;  %3701 = vmatprep.subr.bf16.mxu1 %v5007_v47  ;;  %v5086_v46 = vld [vmem:[#allocation2 + $0xc80] ss:$16 sps:$4 sm:$0xff]   ;;  %v5089_v47 = vld [vmem:[#allocation2 + $0xc88] ss:$16 sps:$4 sm:$0xff]  }
 0x190   :  { %3374 = vmatpush1.bf16.msra.mxu0 %v5002_v48  ;;  %3702 = vmatpush1.bf16.msra.mxu1 %v5005_v49  ;;  %v5094_v48 = vld [vmem:[#allocation2 + $0xca4] ss:$16 sps:$4 sm:$0xff]   ;;  %v5097_v49 = vld [vmem:[#allocation2 + $0xcac] ss:$16 sps:$4 sm:$0xff]  }
 0x191   :  { %3375 = vmatprep.subr.bf16.mxu0 %v5010_v50  ;;  %3703 = vmatprep.subr.bf16.mxu1 %v5013_v51  ;;  %v5092_v50 = vld [vmem:[#allocation2 + $0xca0] ss:$16 sps:$4 sm:$0xff]   ;;  %v5095_v51 = vld [vmem:[#allocation2 + $0xca8] ss:$16 sps:$4 sm:$0xff]  }
 0x194   :  { %3376 = vmatpush1.bf16.msra.mxu0 %v5008_v52  ;;  %3704 = vmatpush1.bf16.msra.mxu1 %v5011_v53  ;;  %v5100_v52 = vld [vmem:[#allocation2 + $0xcc4] ss:$16 sps:$4 sm:$0xff]   ;;  %v5103_v53 = vld [vmem:[#allocation2 + $0xccc] ss:$16 sps:$4 sm:$0xff]  }
 0x195   :  { %3377 = vmatprep.subr.bf16.mxu0 %v5016_v54  ;;  %3705 = vmatprep.subr.bf16.mxu1 %v5019_v55  ;;  %v5098_v54 = vld [vmem:[#allocation2 + $0xcc0] ss:$16 sps:$4 sm:$0xff]   ;;  %v5101_v55 = vld [vmem:[#allocation2 + $0xcc8] ss:$16 sps:$4 sm:$0xff]  }
 0x198   :  { %3378 = vmatpush1.bf16.msra.mxu0 %v5014_v56  ;;  %3706 = vmatpush1.bf16.msra.mxu1 %v5017_v57  ;;  %v5106_v56 = vld [vmem:[#allocation2 + $0xce4] ss:$16 sps:$4 sm:$0xff]   ;;  %v5109_v57 = vld [vmem:[#allocation2 + $0xcec] ss:$16 sps:$4 sm:$0xff]  }
 0x199   :  { %3379 = vmatprep.subr.bf16.mxu0 %v5022_v58  ;;  %3707 = vmatprep.subr.bf16.mxu1 %v5025_v59  ;;  %v5104_v58 = vld [vmem:[#allocation2 + $0xce0] ss:$16 sps:$4 sm:$0xff]   ;;  %v5107_v59 = vld [vmem:[#allocation2 + $0xce8] ss:$16 sps:$4 sm:$0xff]  }
 0x19c   :  { %3380 = vmatpush1.bf16.msra.mxu0 %v5020_v60  ;;  %3708 = vmatpush1.bf16.msra.mxu1 %v5023_v61  ;;  %v5112_v60 = vld [vmem:[#allocation2 + $0xd04] ss:$16 sps:$4 sm:$0xff]   ;;  %v5115_v61 = vld [vmem:[#allocation2 + $0xd0c] ss:$16 sps:$4 sm:$0xff]  }
 0x19d   :  { %3381 = vmatprep.subr.bf16.mxu0 %v5028_v62  ;;  %3709 = vmatprep.subr.bf16.mxu1 %v5031_v63  ;;  %v5110_v62 = vld [vmem:[#allocation2 + $0xd00] ss:$16 sps:$4 sm:$0xff]   ;;  %v5113_v63 = vld [vmem:[#allocation2 + $0xd08] ss:$16 sps:$4 sm:$0xff]  }
 0x1a0   :  { %3382 = vmatpush1.bf16.msra.mxu0 %v5026_v0  ;;  %3710 = vmatpush1.bf16.msra.mxu1 %v5029_v1  ;;  %v5118_v0 = vld [vmem:[#allocation2 + $0xd24] ss:$16 sps:$4 sm:$0xff]   ;;  %v5121_v1 = vld [vmem:[#allocation2 + $0xd2c] ss:$16 sps:$4 sm:$0xff]  }
 0x1a1   :  { %3383 = vmatprep.subr.bf16.mxu0 %v5034_v2  ;;  %3711 = vmatprep.subr.bf16.mxu1 %v5037_v3  ;;  %v5116_v2 = vld [vmem:[#allocation2 + $0xd20] ss:$16 sps:$4 sm:$0xff]   ;;  %v5119_v3 = vld [vmem:[#allocation2 + $0xd28] ss:$16 sps:$4 sm:$0xff]  }
 0x1a4   :  { %3384 = vmatpush1.bf16.msra.mxu0 %v5032_v4  ;;  %3712 = vmatpush1.bf16.msra.mxu1 %v5035_v5  ;;  %v5124_v4 = vld [vmem:[#allocation2 + $0xd44] ss:$16 sps:$4 sm:$0xff]   ;;  %v5127_v5 = vld [vmem:[#allocation2 + $0xd4c] ss:$16 sps:$4 sm:$0xff]  }
 0x1a5   :  { %3385 = vmatprep.subr.bf16.mxu0 %v5040_v6  ;;  %3713 = vmatprep.subr.bf16.mxu1 %v5043_v7  ;;  %v5122_v6 = vld [vmem:[#allocation2 + $0xd40] ss:$16 sps:$4 sm:$0xff]   ;;  %v5125_v7 = vld [vmem:[#allocation2 + $0xd48] ss:$16 sps:$4 sm:$0xff]  }
 0x1a8   :  { %3386 = vmatpush1.bf16.msra.mxu0 %v5038_v8  ;;  %3714 = vmatpush1.bf16.msra.mxu1 %v5041_v9  ;;  %v5130_v8 = vld [vmem:[#allocation2 + $0xd64] ss:$16 sps:$4 sm:$0xff]   ;;  %v5133_v9 = vld [vmem:[#allocation2 + $0xd6c] ss:$16 sps:$4 sm:$0xff]  }
 0x1a9   :  { %3387 = vmatprep.subr.bf16.mxu0 %v5046_v10  ;;  %3715 = vmatprep.subr.bf16.mxu1 %v5049_v11  ;;  %v5128_v10 = vld [vmem:[#allocation2 + $0xd60] ss:$16 sps:$4 sm:$0xff]   ;;  %v5131_v11 = vld [vmem:[#allocation2 + $0xd68] ss:$16 sps:$4 sm:$0xff]  }
 0x1ac   :  { %3388 = vmatpush1.bf16.msra.mxu0 %v5044_v12  ;;  %3716 = vmatpush1.bf16.msra.mxu1 %v5047_v13  ;;  %v5136_v12 = vld [vmem:[#allocation2 + $0xd84] ss:$16 sps:$4 sm:$0xff]   ;;  %v5139_v13 = vld [vmem:[#allocation2 + $0xd8c] ss:$16 sps:$4 sm:$0xff]  }
 0x1ad   :  { %3389 = vmatprep.subr.bf16.mxu0 %v5052_v14  ;;  %3717 = vmatprep.subr.bf16.mxu1 %v5055_v15  ;;  %v5134_v14 = vld [vmem:[#allocation2 + $0xd80] ss:$16 sps:$4 sm:$0xff]   ;;  %v5137_v15 = vld [vmem:[#allocation2 + $0xd88] ss:$16 sps:$4 sm:$0xff]  }
 0x1b0   :  { %3390 = vmatpush1.bf16.msra.mxu0 %v5050_v16  ;;  %3718 = vmatpush1.bf16.msra.mxu1 %v5053_v17  ;;  %v5142_v16 = vld [vmem:[#allocation2 + $0xda4] ss:$16 sps:$4 sm:$0xff]   ;;  %v5145_v17 = vld [vmem:[#allocation2 + $0xdac] ss:$16 sps:$4 sm:$0xff]  }
 0x1b1   :  { %3391 = vmatprep.subr.bf16.mxu0 %v5058_v18  ;;  %3719 = vmatprep.subr.bf16.mxu1 %v5061_v20  ;;  %v5140_v18 = vld [vmem:[#allocation2 + $0xda0] ss:$16 sps:$4 sm:$0xff]   ;;  %v5143_v20 = vld [vmem:[#allocation2 + $0xda8] ss:$16 sps:$4 sm:$0xff]  }
 0x1b4   :  { %3392 = vmatpush1.bf16.msra.mxu0 %v5056_v22  ;;  %3720 = vmatpush1.bf16.msra.mxu1 %v5059_v23  ;;  %v5148_v22 = vld [vmem:[#allocation2 + $0xdc4] ss:$16 sps:$4 sm:$0xff]   ;;  %v5151_v23 = vld [vmem:[#allocation2 + $0xdcc] ss:$16 sps:$4 sm:$0xff]  }
 0x1b5   :  { %3402 = vmatprep.subr.bf16.mxu0 %v5064_v25  ;;  %3730 = vmatprep.subr.bf16.mxu1 %v5067_v26  ;;  %v5146_v25 = vld [vmem:[#allocation2 + $0xdc0] ss:$16 sps:$4 sm:$0xff]   ;;  %v5149_v26 = vld [vmem:[#allocation2 + $0xdc8] ss:$16 sps:$4 sm:$0xff]  }
 0x1b7   :  { %3394 = vmatmul.mubr.bf16.vlgmr.msra.gmra.mrb[0].mxu0 %v78_v27  ;;  %3722 = vmatmul.mubr.bf16.vlgmr.msra.gmra.mrb[0].mxu1 %v78_v27  ;;  %v5154_v27 = vld [vmem:[#allocation2 + $0xde4] ss:$16 sps:$4 sm:$0xff]  }
 0x1b8   :  { %3403 = vmatpush1.bf16.msra.mxu0 %v5062_v29  ;;  %3731 = vmatpush1.bf16.msra.mxu1 %v5065_v30  ;;  %v5157_v29 = vld [vmem:[#allocation2 + $0xdec] ss:$16 sps:$4 sm:$0xff]   ;;  %v5152_v30 = vld [vmem:[#allocation2 + $0xde0] ss:$16 sps:$4 sm:$0xff]  }
 0x1b9   :  { %3404 = vmatprep.subr.bf16.mxu0 %v5070_v31  ;;  %3732 = vmatprep.subr.bf16.mxu1 %v5073_v32  ;;  %v5155_v31 = vld [vmem:[#allocation2 + $0xde8] ss:$16 sps:$4 sm:$0xff]  }
 0x1ba   :  { %3434 = vmatprep.mubr.bf16.mxu0 %v81_v33  ;;  %3762 = vmatprep.mubr.bf16.mxu1 %v81_v33  ;;  %v5454_v32 = vld [vmem:[#allocation7 + $0x60] sm:$0xff] }
 0x1bb   :  { %v5160_v33 = vld [vmem:[#allocation2 + $0xe04] ss:$16 sps:$4 sm:$0xff]  }
 0x1bc   :  { %3405 = vmatpush1.bf16.msra.mxu0 %v5068_v34  ;;  %3733 = vmatpush1.bf16.msra.mxu1 %v5071_v35  ;;  %v5163_v34 = vld [vmem:[#allocation2 + $0xe0c] ss:$16 sps:$4 sm:$0xff]   ;;  %v80_v35 = vpack.c.bf16 %v5454_v32, %v5454_v32 }
 0x1bd   :  { %3406 = vmatprep.subr.bf16.mxu0 %v5076_v36  ;;  %3734 = vmatprep.subr.bf16.mxu1 %v5079_v37  ;;  %v5458_v36 = vld [vmem:[#allocation7 + $0x78] sm:$0xff] }
 0x1be   :  { %v5158_v37 = vld [vmem:[#allocation2 + $0xe00] ss:$16 sps:$4 sm:$0xff]  }
 0x1c0   :  { %3407 = vmatpush1.bf16.msra.mxu0 %v5074_v38  ;;  %3735 = vmatpush1.bf16.msra.mxu1 %v5077_v39  ;;  %v5161_v38 = vld [vmem:[#allocation2 + $0xe08] ss:$16 sps:$4 sm:$0xff]   ;;  %v5166_v39 = vld [vmem:[#allocation2 + $0xe24] ss:$16 sps:$4 sm:$0xff]  }
 0x1c1   :  { %3408 = vmatprep.subr.bf16.mxu0 %v5082_v40  ;;  %3736 = vmatprep.subr.bf16.mxu1 %v5085_v41  ;;  %v5169_v40 = vld [vmem:[#allocation2 + $0xe2c] ss:$16 sps:$4 sm:$0xff]   ;;  %v83_v41 = vpack.c.bf16 %v5458_v36, %v5458_v36 }
 0x1c4   :  { %3409 = vmatpush1.bf16.msra.mxu0 %v5080_v42  ;;  %3737 = vmatpush1.bf16.msra.mxu1 %v5083_v43  ;;  %v5164_v42 = vld [vmem:[#allocation2 + $0xe20] ss:$16 sps:$4 sm:$0xff]   ;;  %v5167_v43 = vld [vmem:[#allocation2 + $0xe28] ss:$16 sps:$4 sm:$0xff]  }
 0x1c5   :  { %3410 = vmatprep.subr.bf16.mxu0 %v5088_v44  ;;  %3738 = vmatprep.subr.bf16.mxu1 %v5091_v45  ;;  %v5172_v44 = vld [vmem:[#allocation2 + $0xe44] ss:$16 sps:$4 sm:$0xff]   ;;  %v5175_v45 = vld [vmem:[#allocation2 + $0xe4c] ss:$16 sps:$4 sm:$0xff]  }
 0x1c8   :  { %3411 = vmatpush1.bf16.msra.mxu0 %v5086_v46  ;;  %3739 = vmatpush1.bf16.msra.mxu1 %v5089_v47  ;;  %v5170_v46 = vld [vmem:[#allocation2 + $0xe40] ss:$16 sps:$4 sm:$0xff]   ;;  %v5173_v47 = vld [vmem:[#allocation2 + $0xe48] ss:$16 sps:$4 sm:$0xff]  }
 0x1c9   :  { %3412 = vmatprep.subr.bf16.mxu0 %v5094_v48  ;;  %3740 = vmatprep.subr.bf16.mxu1 %v5097_v49  ;;  %v5178_v48 = vld [vmem:[#allocation2 + $0xe64] ss:$16 sps:$4 sm:$0xff]   ;;  %v5181_v49 = vld [vmem:[#allocation2 + $0xe6c] ss:$16 sps:$4 sm:$0xff]  }
 0x1cc   :  { %3413 = vmatpush1.bf16.msra.mxu0 %v5092_v50  ;;  %3741 = vmatpush1.bf16.msra.mxu1 %v5095_v51  ;;  %v5176_v50 = vld [vmem:[#allocation2 + $0xe60] ss:$16 sps:$4 sm:$0xff]   ;;  %v5179_v51 = vld [vmem:[#allocation2 + $0xe68] ss:$16 sps:$4 sm:$0xff]  }
 0x1cd   :  { %3414 = vmatprep.subr.bf16.mxu0 %v5100_v52  ;;  %3742 = vmatprep.subr.bf16.mxu1 %v5103_v53  ;;  %v5184_v52 = vld [vmem:[#allocation2 + $0xe84] ss:$16 sps:$4 sm:$0xff]   ;;  %v5187_v53 = vld [vmem:[#allocation2 + $0xe8c] ss:$16 sps:$4 sm:$0xff]  }
 0x1d0   :  { %3415 = vmatpush1.bf16.msra.mxu0 %v5098_v54  ;;  %3743 = vmatpush1.bf16.msra.mxu1 %v5101_v55  ;;  %v5182_v54 = vld [vmem:[#allocation2 + $0xe80] ss:$16 sps:$4 sm:$0xff]   ;;  %v5185_v55 = vld [vmem:[#allocation2 + $0xe88] ss:$16 sps:$4 sm:$0xff]  }
 0x1d1   :  { %3416 = vmatprep.subr.bf16.mxu0 %v5106_v56  ;;  %3744 = vmatprep.subr.bf16.mxu1 %v5109_v57  ;;  %v5190_v56 = vld [vmem:[#allocation2 + $0xea4] ss:$16 sps:$4 sm:$0xff]   ;;  %v5193_v57 = vld [vmem:[#allocation2 + $0xeac] ss:$16 sps:$4 sm:$0xff]  }
 0x1d4   :  { %3417 = vmatpush1.bf16.msra.mxu0 %v5104_v58  ;;  %3745 = vmatpush1.bf16.msra.mxu1 %v5107_v59  ;;  %v5188_v58 = vld [vmem:[#allocation2 + $0xea0] ss:$16 sps:$4 sm:$0xff]   ;;  %v5191_v59 = vld [vmem:[#allocation2 + $0xea8] ss:$16 sps:$4 sm:$0xff]  }
 0x1d5   :  { %3418 = vmatprep.subr.bf16.mxu0 %v5112_v60  ;;  %3746 = vmatprep.subr.bf16.mxu1 %v5115_v61  ;;  %v5196_v60 = vld [vmem:[#allocation2 + $0xec4] ss:$16 sps:$4 sm:$0xff]   ;;  %v5199_v61 = vld [vmem:[#allocation2 + $0xecc] ss:$16 sps:$4 sm:$0xff]  }
 0x1d8   :  { %3419 = vmatpush1.bf16.msra.mxu0 %v5110_v62  ;;  %3747 = vmatpush1.bf16.msra.mxu1 %v5113_v63  ;;  %v5194_v62 = vld [vmem:[#allocation2 + $0xec0] ss:$16 sps:$4 sm:$0xff]   ;;  %v5197_v63 = vld [vmem:[#allocation2 + $0xec8] ss:$16 sps:$4 sm:$0xff]  }
 0x1d9   :  { %3420 = vmatprep.subr.bf16.mxu0 %v5118_v0  ;;  %3748 = vmatprep.subr.bf16.mxu1 %v5121_v1  ;;  %v5202_v0 = vld [vmem:[#allocation2 + $0xee4] ss:$16 sps:$4 sm:$0xff]   ;;  %v5205_v1 = vld [vmem:[#allocation2 + $0xeec] ss:$16 sps:$4 sm:$0xff]  }
 0x1dc   :  { %3421 = vmatpush1.bf16.msra.mxu0 %v5116_v2  ;;  %3749 = vmatpush1.bf16.msra.mxu1 %v5119_v3  ;;  %v5200_v2 = vld [vmem:[#allocation2 + $0xee0] ss:$16 sps:$4 sm:$0xff]   ;;  %v5203_v3 = vld [vmem:[#allocation2 + $0xee8] ss:$16 sps:$4 sm:$0xff]  }
 0x1dd   :  { %3422 = vmatprep.subr.bf16.mxu0 %v5124_v4  ;;  %3750 = vmatprep.subr.bf16.mxu1 %v5127_v5  ;;  %v5208_v4 = vld [vmem:[#allocation2 + $0xf04] ss:$16 sps:$4 sm:$0xff]   ;;  %v5211_v5 = vld [vmem:[#allocation2 + $0xf0c] ss:$16 sps:$4 sm:$0xff]  }
 0x1e0   :  { %3423 = vmatpush1.bf16.msra.mxu0 %v5122_v6  ;;  %3751 = vmatpush1.bf16.msra.mxu1 %v5125_v7  ;;  %v5206_v6 = vld [vmem:[#allocation2 + $0xf00] ss:$16 sps:$4 sm:$0xff]   ;;  %v5209_v7 = vld [vmem:[#allocation2 + $0xf08] ss:$16 sps:$4 sm:$0xff]  }
 0x1e1   :  { %3424 = vmatprep.subr.bf16.mxu0 %v5130_v8  ;;  %3752 = vmatprep.subr.bf16.mxu1 %v5133_v9  ;;  %v5214_v8 = vld [vmem:[#allocation2 + $0xf24] ss:$16 sps:$4 sm:$0xff]   ;;  %v5217_v9 = vld [vmem:[#allocation2 + $0xf2c] ss:$16 sps:$4 sm:$0xff]  }
 0x1e4   :  { %3425 = vmatpush1.bf16.msra.mxu0 %v5128_v10  ;;  %3753 = vmatpush1.bf16.msra.mxu1 %v5131_v11  ;;  %v5212_v10 = vld [vmem:[#allocation2 + $0xf20] ss:$16 sps:$4 sm:$0xff]   ;;  %v5215_v11 = vld [vmem:[#allocation2 + $0xf28] ss:$16 sps:$4 sm:$0xff]  }
 0x1e5   :  { %3426 = vmatprep.subr.bf16.mxu0 %v5136_v12  ;;  %3754 = vmatprep.subr.bf16.mxu1 %v5139_v13  ;;  %v5220_v12 = vld [vmem:[#allocation2 + $0xf44] ss:$16 sps:$4 sm:$0xff]   ;;  %v5223_v13 = vld [vmem:[#allocation2 + $0xf4c] ss:$16 sps:$4 sm:$0xff]  }
 0x1e8   :  { %3427 = vmatpush1.bf16.msra.mxu0 %v5134_v14  ;;  %3755 = vmatpush1.bf16.msra.mxu1 %v5137_v15  ;;  %v5218_v14 = vld [vmem:[#allocation2 + $0xf40] ss:$16 sps:$4 sm:$0xff]   ;;  %v5221_v15 = vld [vmem:[#allocation2 + $0xf48] ss:$16 sps:$4 sm:$0xff]  }
 0x1e9   :  { %3428 = vmatprep.subr.bf16.mxu0 %v5142_v16  ;;  %3756 = vmatprep.subr.bf16.mxu1 %v5145_v17  ;;  %v5226_v16 = vld [vmem:[#allocation2 + $0xf64] ss:$16 sps:$4 sm:$0xff]   ;;  %v5229_v17 = vld [vmem:[#allocation2 + $0xf6c] ss:$16 sps:$4 sm:$0xff]  }
 0x1ec   :  { %3429 = vmatpush1.bf16.msra.mxu0 %v5140_v18  ;;  %3757 = vmatpush1.bf16.msra.mxu1 %v5143_v20  ;;  %v5224_v18 = vld [vmem:[#allocation2 + $0xf60] ss:$16 sps:$4 sm:$0xff]   ;;  %v5227_v20 = vld [vmem:[#allocation2 + $0xf68] ss:$16 sps:$4 sm:$0xff]  }
 0x1ed   :  { %3430 = vmatprep.subr.bf16.mxu0 %v5148_v22  ;;  %3758 = vmatprep.subr.bf16.mxu1 %v5151_v23  ;;  %v5232_v22 = vld [vmem:[#allocation2 + $0xf84] ss:$16 sps:$4 sm:$0xff]   ;;  %v5235_v23 = vld [vmem:[#allocation2 + $0xf8c] ss:$16 sps:$4 sm:$0xff]  }
 0x1f0   :  { %3431 = vmatpush1.bf16.msra.mxu0 %v5146_v25  ;;  %3759 = vmatpush1.bf16.msra.mxu1 %v5149_v26  ;;  %v5230_v25 = vld [vmem:[#allocation2 + $0xf80] ss:$16 sps:$4 sm:$0xff]   ;;  %v5233_v26 = vld [vmem:[#allocation2 + $0xf88] ss:$16 sps:$4 sm:$0xff]  }
 0x1f1   :  { %3432 = vmatprep.subr.bf16.mxu0 %v5154_v27  ;;  %3760 = vmatprep.subr.bf16.mxu1 %v5157_v29  ;;  %v5238_v27 = vld [vmem:[#allocation2 + $0xfa4] ss:$16 sps:$4 sm:$0xff]   ;;  %v5241_v29 = vld [vmem:[#allocation2 + $0xfac] ss:$16 sps:$4 sm:$0xff]  }
 0x1f4   :  { %3433 = vmatpush1.bf16.msra.mxu0 %v5152_v30  ;;  %3761 = vmatpush1.bf16.msra.mxu1 %v5155_v31  ;;  %v5236_v30 = vld [vmem:[#allocation2 + $0xfa0] ss:$16 sps:$4 sm:$0xff]   ;;  %v5239_v31 = vld [vmem:[#allocation2 + $0xfa8] ss:$16 sps:$4 sm:$0xff]  }
 0x1f5   :  { %3443 = vmatprep.subr.bf16.mxu0 %v5160_v33  ;;  %3771 = vmatprep.subr.bf16.mxu1 %v5163_v34  ;;  %v5244_v33 = vld [vmem:[#allocation2 + $0xfc4] ss:$16 sps:$4 sm:$0xff]   ;;  %v5247_v34 = vld [vmem:[#allocation2 + $0xfcc] ss:$16 sps:$4 sm:$0xff]  }
 0x1f7   :  { %3435 = vmatmul.mubr.bf16.vlgmr.msra.gmra.mrb[0].mxu0 %v80_v35  ;;  %3763 = vmatmul.mubr.bf16.vlgmr.msra.gmra.mrb[0].mxu1 %v80_v35  ;;  %v5242_v35 = vld [vmem:[#allocation2 + $0xfc0] ss:$16 sps:$4 sm:$0xff]  }
 0x1f8   :  { %3444 = vmatpush1.bf16.msra.mxu0 %v5158_v37  ;;  %3772 = vmatpush1.bf16.msra.mxu1 %v5161_v38  ;;  %v5245_v37 = vld [vmem:[#allocation2 + $0xfc8] ss:$16 sps:$4 sm:$0xff]   ;;  %v5250_v38 = vld [vmem:[#allocation2 + $0xfe4] ss:$16 sps:$4 sm:$0xff]  }
 0x1f9   :  { %3445 = vmatprep.subr.bf16.mxu0 %v5166_v39  ;;  %3773 = vmatprep.subr.bf16.mxu1 %v5169_v40  ;;  %v5253_v39 = vld [vmem:[#allocation2 + $0xfec] ss:$16 sps:$4 sm:$0xff]   ;;  %v5248_v40 = vld [vmem:[#allocation2 + $0xfe0] ss:$16 sps:$4 sm:$0xff]  }
 0x1fa   :  { %3475 = vmatprep.mubr.bf16.mxu0 %v83_v41  ;;  %3803 = vmatprep.mubr.bf16.mxu1 %v83_v41  ;;  %v5251_v41 = vld [vmem:[#allocation2 + $0xfe8] ss:$16 sps:$4 sm:$0xff]  }
 0x1fc   :  { %3446 = vmatpush1.bf16.msra.mxu0 %v5164_v42  ;;  %3774 = vmatpush1.bf16.msra.mxu1 %v5167_v43  ;;  %v5462_v42 = vld [vmem:[#allocation7 + $0x70] sm:$0xff] }
 0x1fd   :  { %3447 = vmatprep.subr.bf16.mxu0 %v5172_v44  ;;  %3775 = vmatprep.subr.bf16.mxu1 %v5175_v45  ;;  %v82_v43 = vpack.c.bf16 %v5462_v42, %v5462_v42  ;;  %v3818_v44 = vlaneseq }
 0x200   :  { %3448 = vmatpush1.bf16.msra.mxu0 %v5170_v46  ;;  %3776 = vmatpush1.bf16.msra.mxu1 %v5173_v47  ;;  %v3819_v47 = vshrl.u32 %v3818_v44, 7 }
 0x201   :  { %3449 = vmatprep.subr.bf16.mxu0 %v5178_v48  ;;  %3777 = vmatprep.subr.bf16.mxu1 %v5181_v49 }
 0x204   :  { %3450 = vmatpush1.bf16.msra.mxu0 %v5176_v50  ;;  %3778 = vmatpush1.bf16.msra.mxu1 %v5179_v51 }
 0x205   :  { %3451 = vmatprep.subr.bf16.mxu0 %v5184_v52  ;;  %3779 = vmatprep.subr.bf16.mxu1 %v5187_v53 }
 0x208   :  { %3452 = vmatpush1.bf16.msra.mxu0 %v5182_v54  ;;  %3780 = vmatpush1.bf16.msra.mxu1 %v5185_v55  ;;  %v3820_v54 = vsub.s32 0, %v3819_v47  ;;  %v3816_v55 = vld [vmem:[#allocation5] sm:$0xf] }
 0x209   :  { %3453 = vmatprep.subr.bf16.mxu0 %v5190_v56  ;;  %3781 = vmatprep.subr.bf16.mxu1 %v5193_v57  ;;  %v3824_v56 = vsub.s32 1, %v3819_v47 }
 0x20a   :  { %v3821_v57 = vrot.slane %v3816_v55, %v3820_v54 }
 0x20c   :  { %3454 = vmatpush1.bf16.msra.mxu0 %v5188_v58  ;;  %3782 = vmatpush1.bf16.msra.mxu1 %v5191_v59  ;;  %v3828_v58 = vsub.s32 2, %v3819_v47  ;;  %v3825_v59 = vrot.slane %v3816_v55, %v3824_v56 }
 0x20d   :  { %3455 = vmatprep.subr.bf16.mxu0 %v5196_v60  ;;  %3783 = vmatprep.subr.bf16.mxu1 %v5199_v61  ;;  %v3832_v60 = vsub.s32 3, %v3819_v47  ;;  %v5272_v47 = vld [vmem:[#allocation7 + $0x30] sm:$0xff] }
 0x210   :  { %3456 = vmatpush1.bf16.msra.mxu0 %v5194_v62  ;;  %3784 = vmatpush1.bf16.msra.mxu1 %v5197_v63  ;;  %v3829_v63 = vrot.slane %v3816_v55, %v3828_v58 }
 0x211   :  { %3457 = vmatprep.subr.bf16.mxu0 %v5202_v0  ;;  %3785 = vmatprep.subr.bf16.mxu1 %v5205_v1 }
 0x214   :  { %3458 = vmatpush1.bf16.msra.mxu0 %v5200_v2  ;;  %3786 = vmatpush1.bf16.msra.mxu1 %v5203_v3  ;;  %v3833_v2 = vrot.slane %v3816_v55, %v3832_v60 }
 0x215   :  { %3459 = vmatprep.subr.bf16.mxu0 %v5208_v4  ;;  %3787 = vmatprep.subr.bf16.mxu1 %v5211_v5 }
 0x218   :  { %3460 = vmatpush1.bf16.msra.mxu0 %v5206_v6  ;;  %3788 = vmatpush1.bf16.msra.mxu1 %v5209_v7 }
 0x219   :  { %3461 = vmatprep.subr.bf16.mxu0 %v5214_v8  ;;  %3789 = vmatprep.subr.bf16.mxu1 %v5217_v9 }
 0x21c   :  { %3462 = vmatpush1.bf16.msra.mxu0 %v5212_v10  ;;  %3790 = vmatpush1.bf16.msra.mxu1 %v5215_v11 }
 0x21d   :  { %3463 = vmatprep.subr.bf16.mxu0 %v5220_v12  ;;  %3791 = vmatprep.subr.bf16.mxu1 %v5223_v13 }
 0x220   :  { %3464 = vmatpush1.bf16.msra.mxu0 %v5218_v14  ;;  %3792 = vmatpush1.bf16.msra.mxu1 %v5221_v15 }
 0x221   :  { %3465 = vmatprep.subr.bf16.mxu0 %v5226_v16  ;;  %3793 = vmatprep.subr.bf16.mxu1 %v5229_v17 }
 0x224   :  { %3466 = vmatpush1.bf16.msra.mxu0 %v5224_v18  ;;  %3794 = vmatpush1.bf16.msra.mxu1 %v5227_v20 }
 0x225   :  { %3467 = vmatprep.subr.bf16.mxu0 %v5232_v22  ;;  %3795 = vmatprep.subr.bf16.mxu1 %v5235_v23 }
 0x228   :  { %3468 = vmatpush1.bf16.msra.mxu0 %v5230_v25  ;;  %3796 = vmatpush1.bf16.msra.mxu1 %v5233_v26 }
 0x229   :  { %3469 = vmatprep.subr.bf16.mxu0 %v5238_v27  ;;  %3797 = vmatprep.subr.bf16.mxu1 %v5241_v29 }
 0x22c   :  { %3470 = vmatpush1.bf16.msra.mxu0 %v5236_v30  ;;  %3798 = vmatpush1.bf16.msra.mxu1 %v5239_v31 }
 0x22d   :  { %3471 = vmatprep.subr.bf16.mxu0 %v5244_v33  ;;  %3799 = vmatprep.subr.bf16.mxu1 %v5247_v34  ;;  %v5266_v33 = vld [vmem:[#allocation7] sm:$0xff] }
 0x230   :  { %3472 = vmatpush1.bf16.msra.mxu0 %v5242_v35  ;;  %3800 = vmatpush1.bf16.msra.mxu1 %v5245_v37  ;;  %v5267_v35 = vld [vmem:[#allocation7 + $0x8] sm:$0xff] }
 0x231   :  { %3473 = vmatprep.subr.bf16.mxu0 %v5250_v38  ;;  %3801 = vmatprep.subr.bf16.mxu1 %v5253_v39  ;;  %v5268_v38 = vld [vmem:[#allocation7 + $0x10] sm:$0xff] }
 0x234   :  { %3474 = vmatpush1.bf16.msra.mxu0 %v5248_v40  ;;  %3802 = vmatpush1.bf16.msra.mxu1 %v5251_v41  ;;  %v5269_v40 = vld [vmem:[#allocation7 + $0x18] sm:$0xff] }
 0x237   :  { %3476 = vmatmul.mubr.bf16.vlgmr.msra.gmra.mrb[0].mxu0 %v82_v43  ;;  %3804 = vmatmul.mubr.bf16.vlgmr.msra.gmra.mrb[0].mxu1 %v82_v43  ;;  %v5270_v43 = vld [vmem:[#allocation7 + $0x20] sm:$0xff] }
 0x30a   :  { %v3477_v45 = vpop.f32.mrb[0].mxu0  ;;  %v3805_v46 = vpop.f32.mrb[0].mxu1 }
 0x30b   :  { %5254 = vtanh.f32 %v3477_v45  ;;  %v3479_v48 = vpop.f32.mrb[1].mxu0  ;;  %v3807_v49 = vpop.f32.mrb[1].mxu1  ;;  %v5271_v45 = vld [vmem:[#allocation7 + $0x28] sm:$0xff] }
 0x30c   :  { %5256 = vtanh.f32 %v3805_v46  ;;  %v3481_v50 = vpop.f32.mrb[2].mxu0  ;;  %v3809_v51 = vpop.f32.mrb[2].mxu1 }
 0x30d   :  { %5258 = vtanh.f32 %v3479_v48  ;;  %v3482_v52 = vpop.f32.mrb[3].mxu0  ;;  %v3810_v53 = vpop.f32.mrb[3].mxu1 }
 0x30e   :  { %5260 = vtanh.f32 %v3807_v49  ;;  %v5273_v49 = vld [vmem:[#allocation7 + $0x38] sm:$0xff]  ;;  %v5274_v52 = vld [vmem:[#allocation7 + $0x48] sm:$0xff] }
 0x315   :  { %v5255_v61 = vpop.eup %5254 }
 0x316   :  { %v5257_v62 = vpop.eup %5256  ;;  %v3838_v0 = vmul.f32 %v5255_v61, %v3821_v57 }
 0x317   :  { %v5259_v1 = vpop.eup %5258  ;;  %v3840_v5 = vmul.f32 %v5257_v62, %v3829_v63 }
 0x318   :  { %v3839_v3 = vmul.f32 %v5259_v1, %v3825_v59  ;;  %v5261_v4 = vpop.eup %5260 }
 0x319   :  { %v3841_v7 = vmul.f32 %v5261_v4, %v3833_v2 }
 0x31a   :  { %v3842_v6 = vadd.f32 %v3839_v3, %v3838_v0 }
 0x31c   :  { %v3843_v8 = vadd.f32 %v3842_v6, %v3840_v5 }
 0x31e   :  { %v3844_v9 = vadd.f32 %v3843_v8, %v3841_v7 }
 0x320   :  { %3845 = vadd.xlane.f32.xlu0 %v3844_v9 }
 0x3ad   :  { %v3846_v10 = vpop.xlane.xlu0 %3845 }
 0x3ae   :  { %v3847_v11 = vrot.slane %v3846_v10, 4 }
 0x3b0   :  { %v3848_v12 = vmax.f32 %v3846_v10, %v3847_v11 }
 0x3b2   :  { %v3849_v13 = vrot.slane %v3848_v12, 2 }
 0x3b4   :  { %v3850_v14 = vmax.f32 %v3848_v12, %v3849_v13 }
 0x3b6   :  { %v3851_v15 = vrot.slane %v3850_v14, 1 }
 0x3b8   :  { %v3852_v16 = vmax.f32 %v3850_v14, %v3851_v15 }
 0x3ba   :  { %v3853_v17 = vsub.f32 %v3846_v10, %v3852_v16 }
 0x3bc   :  { %v3854_v18 = vmul.f32 1.442695, %v3853_v17 }
 0x3be   :  { %5262 = vpow2.f32 %v3854_v18 }
 0x3c8   :  { %v5263_v20 = vpop.eup %5262 }
 0x3c9   :  { %v3856_v22 = vrot.slane %v5263_v20, 4 }
 0x3cb   :  { %v3857_v23 = vadd.f32 %v5263_v20, %v3856_v22 }
 0x3cd   :  { %v3858_v25 = vrot.slane %v3857_v23, 2 }
 0x3cf   :  { %v3859_v26 = vadd.f32 %v3858_v25, %v3857_v23 }
 0x3d1   :  { %v3860_v27 = vrot.slane %v3859_v26, 1 }
 0x3d3   :  { %v3861_v29 = vadd.f32 %v3860_v27, %v3859_v26 }
 0x3d5   :  { %5264 = vrcp.f32 %v3861_v29 }
 0x3df   :  { %v5265_v30 = vpop.eup %5264 }
 0x3e0   :  { %v3863_v31 = vmul.f32 %v5265_v30, %v5263_v20 }
 0x3e2   :  { %v3864_v34 = vmul.f32 %v5266_v33, %v3863_v31  ;;  %v3865_v37 = vmul.f32 %v5267_v35, %v3863_v31  ;;  %v3866_v39 = vmul.f32 %v5268_v38, %v3863_v31  ;;  %v3867_v41 = vmul.f32 %v5269_v40, %v3863_v31 }
 0x3e3   :  { %v3868_v44 = vmul.f32 %v5270_v43, %v3863_v31  ;;  %v3869_v46 = vmul.f32 %v5271_v45, %v3863_v31  ;;  %v3870_v48 = vmul.f32 %v5272_v47, %v3863_v31  ;;  %v3871_v50 = vmul.f32 %v5273_v49, %v3863_v31 }
 0x3e4   :  { %v3872_v51 = vmul.f32 %v3863_v31, %v5438_v19  ;;  %v3873_v53 = vmul.f32 %v5274_v52, %v3863_v31  ;;  %v3874_v54 = vmul.f32 %v3863_v31, %v5446_v24  ;;  %v3875_v55 = vmul.f32 %v3863_v31, %v5440_v21  ;;  %3880 = vst [vmem:[#allocation8] sm:$0xff] %v3864_v34 }
 0x3e5   :  { %3881 = vst [vmem:[#allocation8 + $0x8] sm:$0xff] %v3865_v37  ;;  %3882 = vst [vmem:[#allocation8 + $0x10] sm:$0xff] %v3866_v39  ;;  %v3876_v56 = vmul.f32 %v3863_v31, %v5454_v32  ;;  %v3877_v57 = vmul.f32 %v3863_v31, %v5450_v28  ;;  %v3878_v58 = vmul.f32 %v3863_v31, %v5462_v42 }
 0x3e6   :  { %3883 = vst [vmem:[#allocation8 + $0x18] sm:$0xff] %v3867_v41  ;;  %v3879_v59 = vmul.f32 %v3863_v31, %v5458_v36  ;;  %3884 = vst [vmem:[#allocation8 + $0x20] sm:$0xff] %v3868_v44 }
 0x3e7   :  { %3885 = vst [vmem:[#allocation8 + $0x28] sm:$0xff] %v3869_v46  ;;  %3886 = vst [vmem:[#allocation8 + $0x30] sm:$0xff] %v3870_v48 }
 0x3e8   :  { %3887 = vst [vmem:[#allocation8 + $0x38] sm:$0xff] %v3871_v50  ;;  %3888 = vst [vmem:[#allocation8 + $0x40] sm:$0xff] %v3872_v51 }
 0x3e9   :  { %3889 = vst [vmem:[#allocation8 + $0x48] sm:$0xff] %v3873_v53  ;;  %3890 = vst [vmem:[#allocation8 + $0x50] sm:$0xff] %v3874_v54 }
 0x3ea   :  { %3891 = vst [vmem:[#allocation8 + $0x58] sm:$0xff] %v3875_v55  ;;  %3892 = vst [vmem:[#allocation8 + $0x60] sm:$0xff] %v3876_v56 }
 0x3eb   :  { %3893 = vst [vmem:[#allocation8 + $0x68] sm:$0xff] %v3877_v57  ;;  %3894 = vst [vmem:[#allocation8 + $0x70] sm:$0xff] %v3878_v58 }
 0x3ec   :  { %3895 = vst [vmem:[#allocation8 + $0x78] sm:$0xff] %v3879_v59 }
 0x3ed   :  { %5352 = shalt.err (!%p5349_p0)
}
 0x3ee   :  { %s5353_s25 = scalar_lea.hbm %s5488_s3, 2048 }
 0x3ef   :  { %p5354_p1 = scmp.ne.s32.totalorder %s5488_s3, %s5353_s25  ;;  %p5357_p2 = scmp.lt.u32.totalorder %s5353_s25, %s5488_s3 }
 0x3f1   :  { %p5359_p3 = pnand %p5357_p2, %p5354_p1 }
 0x3f3   :  { %5362 = shalt.err (!%p5359_p3)
}
 0x3f4   :  { %3905 = dma.vmem_to_hbm [thread:$0]  %s3903_s21, 2048, %s5488_s3, [#allocation4]  }
 0x3f5   :  { %5367 = dma.done.wait [#allocation4], 2048  }
 0x3f6   :  { %5368 = vsyncadd [#allocation4], 4294965248 }
 0x3f7   :  { %3909 = vsyncpa [#allocation3], 1 }
 0x3f8   :  { %3910 = vsyncpa [#allocation6], 1 }
 0x3f9   :  { %3911 = vsyncpa [#allocation4], 1 }

</bundles_post_ra>
